<compile_context>
chip_gen: v5e
topology: v5e:2x2
jax: 0.10.0
libtpu: 0.0.40
codegen_flags: <defaults>
</compile_context>

<pallas_src>
import functools

import jax
import jax.numpy as jnp
from jax import lax
from jax.experimental import pallas as pl
from jax.experimental.pallas import tpu as pltpu

EPS = 1e-5  # PyTorch GroupNorm default eps


def _round_up(n, m):
    return (n + m - 1) // m * m


def _erf(x):
    # Abramowitz & Stegun 7.1.26 (|abs err| < 1.5e-7); VPU ops + one EUP exp.
    a1, a2, a3, a4, a5 = 0.254829592, -0.284496736, 1.421413741, -1.453152027, 1.061405429
    p = 0.3275911
    sgn = jnp.where(x >= 0.0, 1.0, -1.0)
    ax = jnp.abs(x)
    t = 1.0 / (1.0 + p * ax)
    poly = ((((a5 * t + a4) * t + a3) * t + a2) * t + a1) * t
    return sgn * (1.0 - poly * jnp.exp(-ax * ax))


def _gelu(x):
    # exact GELU (PyTorch nn.GELU() default, approximate='none')
    return 0.5 * x * (1.0 + _erf(x * 0.7071067811865475))


def _conv3x3(h, w_mat, masks, W, matmul_dtype):
    """3x3 'SAME' conv as a single im2col matmul.

    h:      (cin, N) channel-in-sublane, (batch*spatial)-in-lane, N = Bt*H*W
    w_mat:  (cout, 9*cin_pad) columns ordered (ky, kx, cin_pad)
    masks:  (9, N) hoisted border masks (1 inside, 0 where a tap would read
            across an image border -- also absorbs the cross-image roll wrap).
    Returns (cout, N) float32.
    """
    cin_p = w_mat.shape[1] // 9
    N = h.shape[1]
    if cin_p > h.shape[0]:  # sublane-align the taps (zero rows match zero weight cols)
        h = jnp.concatenate(
            [h, jnp.zeros((cin_p - h.shape[0], N), h.dtype)], axis=0)

    taps = []
    t = 0
    for dy in (-1, 0, 1):
        for dx in (-1, 0, 1):
            off = dy * W + dx
            tap = pltpu.roll(h, shift=(-off) % N, axis=1) if off != 0 else h
            if dy != 0 or dx != 0:
                tap = tap * masks[t:t + 1, :]
            taps.append(tap)
            t += 1
    patches = jnp.concatenate(taps, axis=0)                     # (9*cin_pad, N)
    return jnp.dot(w_mat.astype(matmul_dtype), patches.astype(matmul_dtype),
                   preferred_element_type=jnp.float32)


def _group_norm(h, gamma, beta, seg, segT, gsum, *, num_groups, bt, hw):
    """Per-(image, group) GroupNorm on the folded layout.

    h:     (C, N) with N = bt*hw (bt images side by side in the lane axis)
    gamma, beta: (C, 1)
    seg:   (N, bt) 0/1 image-membership matrix (None when bt == 1)
    segT:  (bt, N)
    gsum:  (C, C) hoisted block-diagonal group-sum matrix
    """
    C, N = h.shape
    cpg = C // num_groups
    cnt = float(cpg * hw)

    if bt == 1:
        s1 = jnp.sum(h, axis=1, keepdims=True)                       # (C, 1)
        s2 = jnp.sum(h * h, axis=1, keepdims=True)                   # (C, 1)
    else:
        # per-image sums via one K=N segment-reduce matmul each
        s1 = jnp.dot(h, seg, preferred_element_type=jnp.float32)     # (C, bt)
        s2 = jnp.dot(h * h, seg, preferred_element_type=jnp.float32)  # (C, bt)

    # combine channels within each group: ONE tiny matmul on packed stats
    stats = jnp.concatenate([s1, s2], axis=1)                        # (C, 2*bt)
    gstats = jnp.dot(gsum, stats, preferred_element_type=jnp.float32)
    g1 = gstats[:, :bt]
    g2 = gstats[:, bt:]

    mu = g1 * (1.0 / cnt)
    var = jnp.maximum(g2 * (1.0 / cnt) - mu * mu, 0.0)
    scale = gamma * lax.rsqrt(var + EPS)                             # (C, bt)
    shift = beta - mu * scale                                        # (C, bt)

    if bt > 1:
        # broadcast per-image affine back over the lane axis (K=bt matmuls)
        scale = jnp.dot(scale, segT, preferred_element_type=jnp.float32)  # (C, N)
        shift = jnp.dot(shift, segT, preferred_element_type=jnp.float32)
    return h * scale + shift


def conv_block_kernel(x_ref, mask_ref, seg_ref, segT_ref, gsum_ref,
                      w1_ref, b1_ref, g1_ref, be1_ref,
                      w2_ref, b2_ref, g2_ref, be2_ref,
                      o_ref, *, W, hw, bt, num_groups, matmul_dtype):
    masks = mask_ref[...]                                    # shared by both convs
    seg = seg_ref[...] if bt > 1 else None
    segT = segT_ref[...] if bt > 1 else None
    gsum = gsum_ref[...]

    x = x_ref[...].astype(jnp.float32)                       # (cin_pad, N)

    # conv1 (3x3, padding=1) -> GroupNorm -> GELU
    h = _conv3x3(x, w1_ref[...], masks, W, matmul_dtype) + b1_ref[...]
    h = _gelu(_group_norm(h, g1_ref[...], be1_ref[...], seg, segT, gsum,
                          num_groups=num_groups, bt=bt, hw=hw))

    # conv2 (3x3, padding=1) -> GroupNorm -> GELU
    h = _conv3x3(h, w2_ref[...], masks, W, matmul_dtype) + b2_ref[...]
    h = _gelu(_group_norm(h, g2_ref[...], be2_ref[...], seg, segT, gsum,
                          num_groups=num_groups, bt=bt, hw=hw))

    o_ref[...] = h.astype(o_ref.dtype)


def conv_block(x_nchw, params, *, num_groups, grid_steps=None,
               matmul_dtype=jnp.float32):
    """x_nchw: (B, cin, H, W); params: PyTorch-layout weights (OIHW) + 1-D vecs.

    Returns (B, cout, H, W) float32.
    """
    B, cin, H, W = x_nchw.shape
    w1, w2 = params["w1"], params["w2"]          # (cout, cin, 3, 3), (cout, cout, 3, 3)
    cout = w1.shape[0]
    assert cout % num_groups == 0
    HW = H * W

    if grid_steps is None:
        # 2 parallel steps keeps both v7x TensorCores busy; on single-TC
        # v5e/v6e the extra step only costs ~0.35us of pipeline overhead.
        grid_steps = 2 if (B % 2 == 0 and B >= 2) else 1
    assert B % grid_steps == 0
    Bt = B // grid_steps
    N = Bt * HW
    assert N % 128 == 0 or grid_steps == 1, "lane block must be 128-aligned"

    cin_pad = _round_up(cin, 8)
    cout_pad = _round_up(cout, 8)

    # ---------------- layout plumbing (one-time XLA work, outside kernel) ----
    # input: (B, cin, H, W) -> (cin_pad, B*HW)  channel-in-sublane, lane = b*HW + pix
    x = jnp.pad(x_nchw.reshape(B, cin, HW).astype(jnp.float32),
                ((0, 0), (0, cin_pad - cin), (0, 0)))
    x = jnp.transpose(x, (1, 0, 2)).reshape(cin_pad, B * HW)

    def pack_w(w, c_logical, c_pad):
        # OIHW -> (cout, 9*c_pad), columns ordered (ky, kx, channel); zero cols
        # for the sublane-alignment padding channels.
        o = w.shape[0]
        w = jnp.transpose(w.astype(jnp.float32), (0, 2, 3, 1))      # (o, 3, 3, c)
        w = jnp.pad(w, ((0, 0), (0, 0), (0, 0), (0, c_pad - c_logical)))
        return w.reshape(o, 9 * c_pad)

    w1_mat = pack_w(w1, cin, cin_pad)
    w2_mat = pack_w(w2, cout, cout_pad)

    col = lambda v: jnp.asarray(v, jnp.float32).reshape(-1, 1)
    b1, b2 = col(params["b1"]), col(params["b2"])
    g1, be1 = col(params["g1"]), col(params["be1"])
    g2, be2 = col(params["g2"]), col(params["be2"])

    # hoisted constants (identical for every grid step) ------------------------
    pos = jnp.arange(N, dtype=jnp.int32) % HW            # per-image pixel index
    yy, xx = pos // W, pos % W
    masks = []
    for dy in (-1, 0, 1):
        for dx in (-1, 0, 1):
            valid = jnp.ones((N,), dtype=bool)
            if dy == -1:
                valid &= yy >= 1
            if dy == 1:
                valid &= yy <= H - 2
            if dx == -1:
                valid &= xx >= 1
            if dx == 1:
                valid &= xx <= W - 2
            masks.append(valid)
    mask_arr = jnp.stack(masks, axis=0).astype(jnp.float32)          # (9, N)

    img = jnp.arange(N, dtype=jnp.int32) // HW
    seg = (img[:, None] == jnp.arange(Bt)[None, :]).astype(jnp.float32)  # (N, Bt)
    segT = jnp.transpose(seg)                                             # (Bt, N)

    grp = jnp.arange(cout, dtype=jnp.int32) // (cout // num_groups)
    gsum = (grp[:, None] == grp[None, :]).astype(jnp.float32)             # (cout, cout)

    kernel = functools.partial(conv_block_kernel, W=W, hw=HW, bt=Bt,
                               num_groups=num_groups, matmul_dtype=matmul_dtype)

    const_inputs = [mask_arr, seg, segT, gsum,
                    w1_mat, b1, g1, be1, w2_mat, b2, g2, be2]

    def const_spec(a):
        return pl.BlockSpec(a.shape, lambda i, _n=a.ndim: (0,) * _n)

    out = pl.pallas_call(
        kernel,
        out_shape=jax.ShapeDtypeStruct((cout, B * HW), jnp.float32),
        grid=(grid_steps,),
        in_specs=[pl.BlockSpec((cin_pad, N), lambda i: (0, i))]
                 + [const_spec(a) for a in const_inputs],
        out_specs=pl.BlockSpec((cout, N), lambda i: (0, i)),
        compiler_params=pltpu.CompilerParams(
            dimension_semantics=("parallel",),
            vmem_limit_bytes=32 * 1024 * 1024),
    )(x, *const_inputs)

    return jnp.transpose(out.reshape(cout, B, HW), (1, 0, 2)).reshape(B, cout, H, W)


# ----------------------------- pure-JAX reference -----------------------------
def ref_forward(x, p, num_groups):
    def gn(h, gamma, beta):
        B, C, H, W = h.shape
        cpg = C // num_groups
        hg = h.reshape(B, num_groups, cpg, H, W)
        mu = jnp.mean(hg, axis=(2, 3, 4), keepdims=True)
        var = jnp.mean((hg - mu) ** 2, axis=(2, 3, 4), keepdims=True)
        hn = (hg - mu) / jnp.sqrt(var + EPS)
        return (hn.reshape(B, C, H, W) * gamma.reshape(1, C, 1, 1)
                + beta.reshape(1, C, 1, 1))

    def conv3(h, w_oihw, b):
        w_hwio = jnp.transpose(w_oihw, (2, 3, 1, 0))
        y = lax.conv_general_dilated(h, w_hwio, (1, 1), "SAME",
                                     dimension_numbers=("NCHW", "HWIO", "NCHW"),
                                     precision=lax.Precision.HIGHEST)
        return y + b.reshape(1, -1, 1, 1)

    gelu = lambda t: jax.nn.gelu(t, approximate=False)   # exact, erf-based
    h = gelu(gn(conv3(x, p["w1"], p["b1"]), p["g1"], p["be1"]))
    h = gelu(gn(conv3(h, p["w2"], p["b2"]), p["g2"], p["be2"]))
    return h


if __name__ == "__main__":
    B, H, W = 2, 16, 16
    cin, cout, G = 4, 8, 2   # num_groups=2 divides out_channels=8

    key = jax.random.PRNGKey(0)
    ks = jax.random.split(key, 9)

    x = jax.random.normal(ks[0], (B, cin, H, W), jnp.float32)
    params = {
        "w1": 0.1 * jax.random.normal(ks[1], (cout, cin, 3, 3), jnp.float32),
        "w2": 0.1 * jax.random.normal(ks[2], (cout, cout, 3, 3), jnp.float32),
        "b1": 0.1 * jax.random.normal(ks[3], (cout,), jnp.float32),
        "b2": 0.1 * jax.random.normal(ks[4], (cout,), jnp.float32),
        "g1": 1.0 + 0.1 * jax.random.normal(ks[5], (cout,), jnp.float32),
        "be1": 0.1 * jax.random.normal(ks[6], (cout,), jnp.float32),
        "g2": 1.0 + 0.1 * jax.random.normal(ks[7], (cout,), jnp.float32),
        "be2": 0.1 * jax.random.normal(ks[8], (cout,), jnp.float32),
    }

    ref = ref_forward(x, params, G)

    # grid_steps=1: whole batch folded into one lane-dense block (v5e/v6e style,
    #               exercises per-image GroupNorm with Bt>1).
    # grid_steps=2: two parallel steps (v7x style, Bt=1 path).
    for gs in (1, 2):
        out = jax.block_until_ready(conv_block(x, params, num_groups=G, grid_steps=gs))
        assert out.shape == ref.shape
        if not jnp.allclose(out, ref, atol=1e-3, rtol=1e-3):
            max_err = float(jnp.max(jnp.abs(out - ref)))
            raise AssertionError(f"mismatch at grid_steps={gs}, max_err={max_err}")

    print("KERNEL_OK")
</pallas_src>

<mosaic_0001>
module attributes {stable_mosaic.version = 11 : i64} {
  func.func @conv_block_kernel(%arg0: i32, %arg1: memref<8x512xf32, #tpu.memory_space<vmem>>, %arg2: memref<9x512xf32, #tpu.memory_space<vmem>>, %arg3: memref<512x2xf32, #tpu.memory_space<vmem>>, %arg4: memref<2x512xf32, #tpu.memory_space<vmem>>, %arg5: memref<8x8xf32, #tpu.memory_space<vmem>>, %arg6: memref<8x72xf32, #tpu.memory_space<vmem>>, %arg7: memref<8x1xf32, #tpu.memory_space<vmem>>, %arg8: memref<8x1xf32, #tpu.memory_space<vmem>>, %arg9: memref<8x1xf32, #tpu.memory_space<vmem>>, %arg10: memref<8x72xf32, #tpu.memory_space<vmem>>, %arg11: memref<8x1xf32, #tpu.memory_space<vmem>>, %arg12: memref<8x1xf32, #tpu.memory_space<vmem>>, %arg13: memref<8x1xf32, #tpu.memory_space<vmem>>, %arg14: memref<8x512xf32, #tpu.memory_space<vmem>>) attributes {dimension_semantics = [#tpu.dimension_semantics<parallel>], iteration_bounds = array<i64: 1>, scalar_prefetch = 0 : i64, scratch_operands = 0 : i64, tpu.core_type = #tpu.core_type<tc>, window_params = [{transform_indices = @transform_0, window_bounds = array<i64: 8, 512>}, {pipeline_mode = #tpu.pipeline_mode<synchronous>, transform_indices = @transform_1, window_bounds = array<i64: 9, 512>}, {pipeline_mode = #tpu.pipeline_mode<synchronous>, transform_indices = @transform_2, window_bounds = array<i64: 512, 2>}, {pipeline_mode = #tpu.pipeline_mode<synchronous>, transform_indices = @transform_3, window_bounds = array<i64: 2, 512>}, {pipeline_mode = #tpu.pipeline_mode<synchronous>, transform_indices = @transform_4, window_bounds = array<i64: 8, 8>}, {pipeline_mode = #tpu.pipeline_mode<synchronous>, transform_indices = @transform_5, window_bounds = array<i64: 8, 72>}, {pipeline_mode = #tpu.pipeline_mode<synchronous>, transform_indices = @transform_6, window_bounds = array<i64: 8, 1>}, {pipeline_mode = #tpu.pipeline_mode<synchronous>, transform_indices = @transform_7, window_bounds = array<i64: 8, 1>}, {pipeline_mode = #tpu.pipeline_mode<synchronous>, transform_indices = @transform_8, window_bounds = array<i64: 8, 1>}, {pipeline_mode = #tpu.pipeline_mode<synchronous>, transform_indices = @transform_9, window_bounds = array<i64: 8, 72>}, {pipeline_mode = #tpu.pipeline_mode<synchronous>, transform_indices = @transform_10, window_bounds = array<i64: 8, 1>}, {pipeline_mode = #tpu.pipeline_mode<synchronous>, transform_indices = @transform_11, window_bounds = array<i64: 8, 1>}, {pipeline_mode = #tpu.pipeline_mode<synchronous>, transform_indices = @transform_12, window_bounds = array<i64: 8, 1>}, {transform_indices = @transform_13, window_bounds = array<i64: 8, 512>}]} {
    %c0 = arith.constant 0 : index
    %c0_0 = arith.constant 0 : index
    %0 = vector.load %arg2[%c0, %c0_0] : memref<9x512xf32, #tpu.memory_space<vmem>>, vector<9x512xf32>
    %c0_1 = arith.constant 0 : index
    %c0_2 = arith.constant 0 : index
    %1 = vector.load %arg3[%c0_1, %c0_2] : memref<512x2xf32, #tpu.memory_space<vmem>>, vector<512x2xf32>
    %c0_3 = arith.constant 0 : index
    %c0_4 = arith.constant 0 : index
    %2 = vector.load %arg4[%c0_3, %c0_4] : memref<2x512xf32, #tpu.memory_space<vmem>>, vector<2x512xf32>
    %c0_5 = arith.constant 0 : index
    %c0_6 = arith.constant 0 : index
    %3 = vector.load %arg5[%c0_5, %c0_6] : memref<8x8xf32, #tpu.memory_space<vmem>>, vector<8x8xf32>
    %c0_7 = arith.constant 0 : index
    %c0_8 = arith.constant 0 : index
    %4 = vector.load %arg1[%c0_7, %c0_8] : memref<8x512xf32, #tpu.memory_space<vmem>>, vector<8x512xf32>
    %c0_9 = arith.constant 0 : index
    %c0_10 = arith.constant 0 : index
    %5 = vector.load %arg6[%c0_9, %c0_10] : memref<8x72xf32, #tpu.memory_space<vmem>>, vector<8x72xf32>
    %c17_i32 = arith.constant 17 : i32
    %6 = tpu.dynamic_rotate %4 by %c17_i32 dim 1 : vector<8x512xf32>, i32 -> vector<8x512xf32>
    %7 = vector.extract_strided_slice %0 {offsets = [0, 0], sizes = [1, 512], strides = [1, 1]} : vector<9x512xf32> to vector<1x512xf32>
    %8 = vector.broadcast %7 : vector<1x512xf32> to vector<8x512xf32>
    %9 = arith.mulf %6, %8 : vector<8x512xf32>
    %c16_i32 = arith.constant 16 : i32
    %10 = tpu.dynamic_rotate %4 by %c16_i32 dim 1 : vector<8x512xf32>, i32 -> vector<8x512xf32>
    %11 = vector.extract_strided_slice %0 {offsets = [1, 0], sizes = [1, 512], strides = [1, 1]} : vector<9x512xf32> to vector<1x512xf32>
    %12 = vector.broadcast %11 : vector<1x512xf32> to vector<8x512xf32>
    %13 = arith.mulf %10, %12 : vector<8x512xf32>
    %c15_i32 = arith.constant 15 : i32
    %14 = tpu.dynamic_rotate %4 by %c15_i32 dim 1 : vector<8x512xf32>, i32 -> vector<8x512xf32>
    %15 = vector.extract_strided_slice %0 {offsets = [2, 0], sizes = [1, 512], strides = [1, 1]} : vector<9x512xf32> to vector<1x512xf32>
    %16 = vector.broadcast %15 : vector<1x512xf32> to vector<8x512xf32>
    %17 = arith.mulf %14, %16 : vector<8x512xf32>
    %c1_i32 = arith.constant 1 : i32
    %18 = tpu.dynamic_rotate %4 by %c1_i32 dim 1 : vector<8x512xf32>, i32 -> vector<8x512xf32>
    %19 = vector.extract_strided_slice %0 {offsets = [3, 0], sizes = [1, 512], strides = [1, 1]} : vector<9x512xf32> to vector<1x512xf32>
    %20 = vector.broadcast %19 : vector<1x512xf32> to vector<8x512xf32>
    %21 = arith.mulf %18, %20 : vector<8x512xf32>
    %c511_i32 = arith.constant 511 : i32
    %22 = tpu.dynamic_rotate %4 by %c511_i32 dim 1 : vector<8x512xf32>, i32 -> vector<8x512xf32>
    %23 = vector.extract_strided_slice %0 {offsets = [5, 0], sizes = [1, 512], strides = [1, 1]} : vector<9x512xf32> to vector<1x512xf32>
    %24 = vector.broadcast %23 : vector<1x512xf32> to vector<8x512xf32>
    %25 = arith.mulf %22, %24 : vector<8x512xf32>
    %c497_i32 = arith.constant 497 : i32
    %26 = tpu.dynamic_rotate %4 by %c497_i32 dim 1 : vector<8x512xf32>, i32 -> vector<8x512xf32>
    %27 = vector.extract_strided_slice %0 {offsets = [6, 0], sizes = [1, 512], strides = [1, 1]} : vector<9x512xf32> to vector<1x512xf32>
    %28 = vector.broadcast %27 : vector<1x512xf32> to vector<8x512xf32>
    %29 = arith.mulf %26, %28 : vector<8x512xf32>
    %c496_i32 = arith.constant 496 : i32
    %30 = tpu.dynamic_rotate %4 by %c496_i32 dim 1 : vector<8x512xf32>, i32 -> vector<8x512xf32>
    %31 = vector.extract_strided_slice %0 {offsets = [7, 0], sizes = [1, 512], strides = [1, 1]} : vector<9x512xf32> to vector<1x512xf32>
    %32 = vector.broadcast %31 : vector<1x512xf32> to vector<8x512xf32>
    %33 = arith.mulf %30, %32 : vector<8x512xf32>
    %c495_i32 = arith.constant 495 : i32
    %34 = tpu.dynamic_rotate %4 by %c495_i32 dim 1 : vector<8x512xf32>, i32 -> vector<8x512xf32>
    %35 = vector.extract_strided_slice %0 {offsets = [8, 0], sizes = [1, 512], strides = [1, 1]} : vector<9x512xf32> to vector<1x512xf32>
    %36 = vector.broadcast %35 : vector<1x512xf32> to vector<8x512xf32>
    %37 = arith.mulf %34, %36 : vector<8x512xf32>
    %38 = tpu.concatenate %9, %13, %17, %21, %4, %25, %29, %33, %37 in 0 : vector<8x512xf32>, vector<8x512xf32>, vector<8x512xf32>, vector<8x512xf32>, vector<8x512xf32>, vector<8x512xf32>, vector<8x512xf32>, vector<8x512xf32>, vector<8x512xf32> -> vector<72x512xf32>
    %cst = arith.constant dense<0.000000e+00> : vector<8x512xf32>
    %39 = tpu.matmul %5, %38, %cst {dimension_numbers = #tpu.dot_dimension_numbers<[1], [0], [0], [1], [0, 0, 1, 1], [], []>} : vector<8x72xf32>, vector<72x512xf32>, vector<8x512xf32> -> vector<8x512xf32>
    %c0_11 = arith.constant 0 : index
    %c0_12 = arith.constant 0 : index
    %40 = vector.load %arg7[%c0_11, %c0_12] : memref<8x1xf32, #tpu.memory_space<vmem>>, vector<8x1xf32>
    %41 = vector.broadcast %40 : vector<8x1xf32> to vector<8x512xf32>
    %42 = arith.addf %39, %41 : vector<8x512xf32>
    %c0_13 = arith.constant 0 : index
    %c0_14 = arith.constant 0 : index
    %43 = vector.load %arg8[%c0_13, %c0_14] : memref<8x1xf32, #tpu.memory_space<vmem>>, vector<8x1xf32>
    %c0_15 = arith.constant 0 : index
    %c0_16 = arith.constant 0 : index
    %44 = vector.load %arg9[%c0_15, %c0_16] : memref<8x1xf32, #tpu.memory_space<vmem>>, vector<8x1xf32>
    %cst_17 = arith.constant dense<0.000000e+00> : vector<8x2xf32>
    %45 = tpu.matmul %42, %1, %cst_17 {dimension_numbers = #tpu.dot_dimension_numbers<[1], [0], [0], [1], [0, 0, 1, 1], [], []>} : vector<8x512xf32>, vector<512x2xf32>, vector<8x2xf32> -> vector<8x2xf32>
    %46 = arith.mulf %42, %42 : vector<8x512xf32>
    %cst_18 = arith.constant dense<0.000000e+00> : vector<8x2xf32>
    %47 = tpu.matmul %46, %1, %cst_18 {dimension_numbers = #tpu.dot_dimension_numbers<[1], [0], [0], [1], [0, 0, 1, 1], [], []>} : vector<8x512xf32>, vector<512x2xf32>, vector<8x2xf32> -> vector<8x2xf32>
    %48 = tpu.concatenate %45, %47 in 1 : vector<8x2xf32>, vector<8x2xf32> -> vector<8x4xf32>
    %cst_19 = arith.constant dense<0.000000e+00> : vector<8x4xf32>
    %49 = tpu.matmul %3, %48, %cst_19 {dimension_numbers = #tpu.dot_dimension_numbers<[1], [0], [0], [1], [0, 0, 1, 1], [], []>} : vector<8x8xf32>, vector<8x4xf32>, vector<8x4xf32> -> vector<8x4xf32>
    %50 = vector.extract_strided_slice %49 {offsets = [0, 0], sizes = [8, 2], strides = [1, 1]} : vector<8x4xf32> to vector<8x2xf32>
    %51 = vector.extract_strided_slice %49 {offsets = [0, 2], sizes = [8, 2], strides = [1, 1]} : vector<8x4xf32> to vector<8x2xf32>
    %cst_20 = arith.constant 9.765625E-4 : f32
    %52 = vector.broadcast %cst_20 : f32 to vector<8x2xf32>
    %53 = arith.mulf %50, %52 : vector<8x2xf32>
    %cst_21 = arith.constant 9.765625E-4 : f32
    %54 = vector.broadcast %cst_21 : f32 to vector<8x2xf32>
    %55 = arith.mulf %51, %54 : vector<8x2xf32>
    %56 = arith.mulf %53, %53 : vector<8x2xf32>
    %57 = arith.subf %55, %56 : vector<8x2xf32>
    %cst_22 = arith.constant 0.000000e+00 : f32
    %58 = vector.broadcast %cst_22 : f32 to vector<8x2xf32>
    %59 = arith.maximumf %57, %58 : vector<8x2xf32>
    %cst_23 = arith.constant 9.99999974E-6 : f32
    %60 = vector.broadcast %cst_23 : f32 to vector<8x2xf32>
    %61 = arith.addf %59, %60 : vector<8x2xf32>
    %62 = math.rsqrt %61 : vector<8x2xf32>
    %63 = vector.broadcast %43 : vector<8x1xf32> to vector<8x2xf32>
    %64 = arith.mulf %63, %62 : vector<8x2xf32>
    %65 = arith.mulf %53, %64 : vector<8x2xf32>
    %66 = vector.broadcast %44 : vector<8x1xf32> to vector<8x2xf32>
    %67 = arith.subf %66, %65 : vector<8x2xf32>
    %cst_24 = arith.constant dense<0.000000e+00> : vector<8x512xf32>
    %68 = tpu.matmul %64, %2, %cst_24 {dimension_numbers = #tpu.dot_dimension_numbers<[1], [0], [0], [1], [0, 0, 1, 1], [], []>} : vector<8x2xf32>, vector<2x512xf32>, vector<8x512xf32> -> vector<8x512xf32>
    %cst_25 = arith.constant dense<0.000000e+00> : vector<8x512xf32>
    %69 = tpu.matmul %67, %2, %cst_25 {dimension_numbers = #tpu.dot_dimension_numbers<[1], [0], [0], [1], [0, 0, 1, 1], [], []>} : vector<8x2xf32>, vector<2x512xf32>, vector<8x512xf32> -> vector<8x512xf32>
    %70 = arith.mulf %42, %68 : vector<8x512xf32>
    %71 = arith.addf %70, %69 : vector<8x512xf32>
    %cst_26 = arith.constant 5.000000e-01 : f32
    %72 = vector.broadcast %cst_26 : f32 to vector<8x512xf32>
    %73 = arith.mulf %72, %71 : vector<8x512xf32>
    %cst_27 = arith.constant 0.707106769 : f32
    %74 = vector.broadcast %cst_27 : f32 to vector<8x512xf32>
    %75 = arith.mulf %71, %74 : vector<8x512xf32>
    %cst_28 = arith.constant 0.000000e+00 : f32
    %76 = vector.broadcast %cst_28 : f32 to vector<8x512xf32>
    %77 = arith.cmpf oge, %75, %76 : vector<8x512xf32>
    %cst_29 = arith.constant 1.000000e+00 : f32
    %cst_30 = arith.constant -1.000000e+00 : f32
    %78 = vector.broadcast %cst_29 : f32 to vector<8x512xf32>
    %79 = vector.broadcast %cst_30 : f32 to vector<8x512xf32>
    %80 = arith.select %77, %78, %79 : vector<8x512xi1>, vector<8x512xf32>
    %81 = math.absf %75 : vector<8x512xf32>
    %cst_31 = arith.constant 0.327591091 : f32
    %82 = vector.broadcast %cst_31 : f32 to vector<8x512xf32>
    %83 = arith.mulf %82, %81 : vector<8x512xf32>
    %cst_32 = arith.constant 1.000000e+00 : f32
    %84 = vector.broadcast %cst_32 : f32 to vector<8x512xf32>
    %85 = arith.addf %84, %83 : vector<8x512xf32>
    %cst_33 = arith.constant 1.000000e+00 : f32
    %86 = vector.broadcast %cst_33 : f32 to vector<8x512xf32>
    %87 = arith.divf %86, %85 : vector<8x512xf32>
    %cst_34 = arith.constant 1.06140542 : f32
    %88 = vector.broadcast %cst_34 : f32 to vector<8x512xf32>
    %89 = arith.mulf %88, %87 : vector<8x512xf32>
    %cst_35 = arith.constant -1.45315206 : f32
    %90 = vector.broadcast %cst_35 : f32 to vector<8x512xf32>
    %91 = arith.addf %89, %90 : vector<8x512xf32>
    %92 = arith.mulf %91, %87 : vector<8x512xf32>
    %cst_36 = arith.constant 1.42141378 : f32
    %93 = vector.broadcast %cst_36 : f32 to vector<8x512xf32>
    %94 = arith.addf %92, %93 : vector<8x512xf32>
    %95 = arith.mulf %94, %87 : vector<8x512xf32>
    %cst_37 = arith.constant -0.284496725 : f32
    %96 = vector.broadcast %cst_37 : f32 to vector<8x512xf32>
    %97 = arith.addf %95, %96 : vector<8x512xf32>
    %98 = arith.mulf %97, %87 : vector<8x512xf32>
    %cst_38 = arith.constant 0.254829586 : f32
    %99 = vector.broadcast %cst_38 : f32 to vector<8x512xf32>
    %100 = arith.addf %98, %99 : vector<8x512xf32>
    %101 = arith.mulf %100, %87 : vector<8x512xf32>
    %cst_39 = arith.constant 0.000000e+00 : f32
    %102 = vector.broadcast %cst_39 : f32 to vector<8x512xf32>
    %103 = arith.subf %102, %81 : vector<8x512xf32>
    %104 = arith.mulf %103, %81 : vector<8x512xf32>
    %105 = math.exp %104 : vector<8x512xf32>
    %106 = arith.mulf %101, %105 : vector<8x512xf32>
    %cst_40 = arith.constant 1.000000e+00 : f32
    %107 = vector.broadcast %cst_40 : f32 to vector<8x512xf32>
    %108 = arith.subf %107, %106 : vector<8x512xf32>
    %109 = arith.mulf %80, %108 : vector<8x512xf32>
    %cst_41 = arith.constant 1.000000e+00 : f32
    %110 = vector.broadcast %cst_41 : f32 to vector<8x512xf32>
    %111 = arith.addf %110, %109 : vector<8x512xf32>
    %112 = arith.mulf %73, %111 : vector<8x512xf32>
    %c0_42 = arith.constant 0 : index
    %c0_43 = arith.constant 0 : index
    %113 = vector.load %arg10[%c0_42, %c0_43] : memref<8x72xf32, #tpu.memory_space<vmem>>, vector<8x72xf32>
    %c17_i32_44 = arith.constant 17 : i32
    %114 = tpu.dynamic_rotate %112 by %c17_i32_44 dim 1 : vector<8x512xf32>, i32 -> vector<8x512xf32>
    %115 = vector.extract_strided_slice %0 {offsets = [0, 0], sizes = [1, 512], strides = [1, 1]} : vector<9x512xf32> to vector<1x512xf32>
    %116 = vector.broadcast %115 : vector<1x512xf32> to vector<8x512xf32>
    %117 = arith.mulf %114, %116 : vector<8x512xf32>
    %c16_i32_45 = arith.constant 16 : i32
    %118 = tpu.dynamic_rotate %112 by %c16_i32_45 dim 1 : vector<8x512xf32>, i32 -> vector<8x512xf32>
    %119 = vector.extract_strided_slice %0 {offsets = [1, 0], sizes = [1, 512], strides = [1, 1]} : vector<9x512xf32> to vector<1x512xf32>
    %120 = vector.broadcast %119 : vector<1x512xf32> to vector<8x512xf32>
    %121 = arith.mulf %118, %120 : vector<8x512xf32>
    %c15_i32_46 = arith.constant 15 : i32
    %122 = tpu.dynamic_rotate %112 by %c15_i32_46 dim 1 : vector<8x512xf32>, i32 -> vector<8x512xf32>
    %123 = vector.extract_strided_slice %0 {offsets = [2, 0], sizes = [1, 512], strides = [1, 1]} : vector<9x512xf32> to vector<1x512xf32>
    %124 = vector.broadcast %123 : vector<1x512xf32> to vector<8x512xf32>
    %125 = arith.mulf %122, %124 : vector<8x512xf32>
    %c1_i32_47 = arith.constant 1 : i32
    %126 = tpu.dynamic_rotate %112 by %c1_i32_47 dim 1 : vector<8x512xf32>, i32 -> vector<8x512xf32>
    %127 = vector.extract_strided_slice %0 {offsets = [3, 0], sizes = [1, 512], strides = [1, 1]} : vector<9x512xf32> to vector<1x512xf32>
    %128 = vector.broadcast %127 : vector<1x512xf32> to vector<8x512xf32>
    %129 = arith.mulf %126, %128 : vector<8x512xf32>
    %c511_i32_48 = arith.constant 511 : i32
    %130 = tpu.dynamic_rotate %112 by %c511_i32_48 dim 1 : vector<8x512xf32>, i32 -> vector<8x512xf32>
    %131 = vector.extract_strided_slice %0 {offsets = [5, 0], sizes = [1, 512], strides = [1, 1]} : vector<9x512xf32> to vector<1x512xf32>
    %132 = vector.broadcast %131 : vector<1x512xf32> to vector<8x512xf32>
    %133 = arith.mulf %130, %132 : vector<8x512xf32>
    %c497_i32_49 = arith.constant 497 : i32
    %134 = tpu.dynamic_rotate %112 by %c497_i32_49 dim 1 : vector<8x512xf32>, i32 -> vector<8x512xf32>
    %135 = vector.extract_strided_slice %0 {offsets = [6, 0], sizes = [1, 512], strides = [1, 1]} : vector<9x512xf32> to vector<1x512xf32>
    %136 = vector.broadcast %135 : vector<1x512xf32> to vector<8x512xf32>
    %137 = arith.mulf %134, %136 : vector<8x512xf32>
    %c496_i32_50 = arith.constant 496 : i32
    %138 = tpu.dynamic_rotate %112 by %c496_i32_50 dim 1 : vector<8x512xf32>, i32 -> vector<8x512xf32>
    %139 = vector.extract_strided_slice %0 {offsets = [7, 0], sizes = [1, 512], strides = [1, 1]} : vector<9x512xf32> to vector<1x512xf32>
    %140 = vector.broadcast %139 : vector<1x512xf32> to vector<8x512xf32>
    %141 = arith.mulf %138, %140 : vector<8x512xf32>
    %c495_i32_51 = arith.constant 495 : i32
    %142 = tpu.dynamic_rotate %112 by %c495_i32_51 dim 1 : vector<8x512xf32>, i32 -> vector<8x512xf32>
    %143 = vector.extract_strided_slice %0 {offsets = [8, 0], sizes = [1, 512], strides = [1, 1]} : vector<9x512xf32> to vector<1x512xf32>
    %144 = vector.broadcast %143 : vector<1x512xf32> to vector<8x512xf32>
    %145 = arith.mulf %142, %144 : vector<8x512xf32>
    %146 = tpu.concatenate %117, %121, %125, %129, %112, %133, %137, %141, %145 in 0 : vector<8x512xf32>, vector<8x512xf32>, vector<8x512xf32>, vector<8x512xf32>, vector<8x512xf32>, vector<8x512xf32>, vector<8x512xf32>, vector<8x512xf32>, vector<8x512xf32> -> vector<72x512xf32>
    %cst_52 = arith.constant dense<0.000000e+00> : vector<8x512xf32>
    %147 = tpu.matmul %113, %146, %cst_52 {dimension_numbers = #tpu.dot_dimension_numbers<[1], [0], [0], [1], [0, 0, 1, 1], [], []>} : vector<8x72xf32>, vector<72x512xf32>, vector<8x512xf32> -> vector<8x512xf32>
    %c0_53 = arith.constant 0 : index
    %c0_54 = arith.constant 0 : index
    %148 = vector.load %arg11[%c0_53, %c0_54] : memref<8x1xf32, #tpu.memory_space<vmem>>, vector<8x1xf32>
    %149 = vector.broadcast %148 : vector<8x1xf32> to vector<8x512xf32>
    %150 = arith.addf %147, %149 : vector<8x512xf32>
    %c0_55 = arith.constant 0 : index
    %c0_56 = arith.constant 0 : index
    %151 = vector.load %arg12[%c0_55, %c0_56] : memref<8x1xf32, #tpu.memory_space<vmem>>, vector<8x1xf32>
    %c0_57 = arith.constant 0 : index
    %c0_58 = arith.constant 0 : index
    %152 = vector.load %arg13[%c0_57, %c0_58] : memref<8x1xf32, #tpu.memory_space<vmem>>, vector<8x1xf32>
    %cst_59 = arith.constant dense<0.000000e+00> : vector<8x2xf32>
    %153 = tpu.matmul %150, %1, %cst_59 {dimension_numbers = #tpu.dot_dimension_numbers<[1], [0], [0], [1], [0, 0, 1, 1], [], []>} : vector<8x512xf32>, vector<512x2xf32>, vector<8x2xf32> -> vector<8x2xf32>
    %154 = arith.mulf %150, %150 : vector<8x512xf32>
    %cst_60 = arith.constant dense<0.000000e+00> : vector<8x2xf32>
    %155 = tpu.matmul %154, %1, %cst_60 {dimension_numbers = #tpu.dot_dimension_numbers<[1], [0], [0], [1], [0, 0, 1, 1], [], []>} : vector<8x512xf32>, vector<512x2xf32>, vector<8x2xf32> -> vector<8x2xf32>
    %156 = tpu.concatenate %153, %155 in 1 : vector<8x2xf32>, vector<8x2xf32> -> vector<8x4xf32>
    %cst_61 = arith.constant dense<0.000000e+00> : vector<8x4xf32>
    %157 = tpu.matmul %3, %156, %cst_61 {dimension_numbers = #tpu.dot_dimension_numbers<[1], [0], [0], [1], [0, 0, 1, 1], [], []>} : vector<8x8xf32>, vector<8x4xf32>, vector<8x4xf32> -> vector<8x4xf32>
    %158 = vector.extract_strided_slice %157 {offsets = [0, 0], sizes = [8, 2], strides = [1, 1]} : vector<8x4xf32> to vector<8x2xf32>
    %159 = vector.extract_strided_slice %157 {offsets = [0, 2], sizes = [8, 2], strides = [1, 1]} : vector<8x4xf32> to vector<8x2xf32>
    %cst_62 = arith.constant 9.765625E-4 : f32
    %160 = vector.broadcast %cst_62 : f32 to vector<8x2xf32>
    %161 = arith.mulf %158, %160 : vector<8x2xf32>
    %cst_63 = arith.constant 9.765625E-4 : f32
    %162 = vector.broadcast %cst_63 : f32 to vector<8x2xf32>
    %163 = arith.mulf %159, %162 : vector<8x2xf32>
    %164 = arith.mulf %161, %161 : vector<8x2xf32>
    %165 = arith.subf %163, %164 : vector<8x2xf32>
    %cst_64 = arith.constant 0.000000e+00 : f32
    %166 = vector.broadcast %cst_64 : f32 to vector<8x2xf32>
    %167 = arith.maximumf %165, %166 : vector<8x2xf32>
    %cst_65 = arith.constant 9.99999974E-6 : f32
    %168 = vector.broadcast %cst_65 : f32 to vector<8x2xf32>
    %169 = arith.addf %167, %168 : vector<8x2xf32>
    %170 = math.rsqrt %169 : vector<8x2xf32>
    %171 = vector.broadcast %151 : vector<8x1xf32> to vector<8x2xf32>
    %172 = arith.mulf %171, %170 : vector<8x2xf32>
    %173 = arith.mulf %161, %172 : vector<8x2xf32>
    %174 = vector.broadcast %152 : vector<8x1xf32> to vector<8x2xf32>
    %175 = arith.subf %174, %173 : vector<8x2xf32>
    %cst_66 = arith.constant dense<0.000000e+00> : vector<8x512xf32>
    %176 = tpu.matmul %172, %2, %cst_66 {dimension_numbers = #tpu.dot_dimension_numbers<[1], [0], [0], [1], [0, 0, 1, 1], [], []>} : vector<8x2xf32>, vector<2x512xf32>, vector<8x512xf32> -> vector<8x512xf32>
    %cst_67 = arith.constant dense<0.000000e+00> : vector<8x512xf32>
    %177 = tpu.matmul %175, %2, %cst_67 {dimension_numbers = #tpu.dot_dimension_numbers<[1], [0], [0], [1], [0, 0, 1, 1], [], []>} : vector<8x2xf32>, vector<2x512xf32>, vector<8x512xf32> -> vector<8x512xf32>
    %178 = arith.mulf %150, %176 : vector<8x512xf32>
    %179 = arith.addf %178, %177 : vector<8x512xf32>
    %cst_68 = arith.constant 5.000000e-01 : f32
    %180 = vector.broadcast %cst_68 : f32 to vector<8x512xf32>
    %181 = arith.mulf %180, %179 : vector<8x512xf32>
    %cst_69 = arith.constant 0.707106769 : f32
    %182 = vector.broadcast %cst_69 : f32 to vector<8x512xf32>
    %183 = arith.mulf %179, %182 : vector<8x512xf32>
    %cst_70 = arith.constant 0.000000e+00 : f32
    %184 = vector.broadcast %cst_70 : f32 to vector<8x512xf32>
    %185 = arith.cmpf oge, %183, %184 : vector<8x512xf32>
    %cst_71 = arith.constant 1.000000e+00 : f32
    %cst_72 = arith.constant -1.000000e+00 : f32
    %186 = vector.broadcast %cst_71 : f32 to vector<8x512xf32>
    %187 = vector.broadcast %cst_72 : f32 to vector<8x512xf32>
    %188 = arith.select %185, %186, %187 : vector<8x512xi1>, vector<8x512xf32>
    %189 = math.absf %183 : vector<8x512xf32>
    %cst_73 = arith.constant 0.327591091 : f32
    %190 = vector.broadcast %cst_73 : f32 to vector<8x512xf32>
    %191 = arith.mulf %190, %189 : vector<8x512xf32>
    %cst_74 = arith.constant 1.000000e+00 : f32
    %192 = vector.broadcast %cst_74 : f32 to vector<8x512xf32>
    %193 = arith.addf %192, %191 : vector<8x512xf32>
    %cst_75 = arith.constant 1.000000e+00 : f32
    %194 = vector.broadcast %cst_75 : f32 to vector<8x512xf32>
    %195 = arith.divf %194, %193 : vector<8x512xf32>
    %cst_76 = arith.constant 1.06140542 : f32
    %196 = vector.broadcast %cst_76 : f32 to vector<8x512xf32>
    %197 = arith.mulf %196, %195 : vector<8x512xf32>
    %cst_77 = arith.constant -1.45315206 : f32
    %198 = vector.broadcast %cst_77 : f32 to vector<8x512xf32>
    %199 = arith.addf %197, %198 : vector<8x512xf32>
    %200 = arith.mulf %199, %195 : vector<8x512xf32>
    %cst_78 = arith.constant 1.42141378 : f32
    %201 = vector.broadcast %cst_78 : f32 to vector<8x512xf32>
    %202 = arith.addf %200, %201 : vector<8x512xf32>
    %203 = arith.mulf %202, %195 : vector<8x512xf32>
    %cst_79 = arith.constant -0.284496725 : f32
    %204 = vector.broadcast %cst_79 : f32 to vector<8x512xf32>
    %205 = arith.addf %203, %204 : vector<8x512xf32>
    %206 = arith.mulf %205, %195 : vector<8x512xf32>
    %cst_80 = arith.constant 0.254829586 : f32
    %207 = vector.broadcast %cst_80 : f32 to vector<8x512xf32>
    %208 = arith.addf %206, %207 : vector<8x512xf32>
    %209 = arith.mulf %208, %195 : vector<8x512xf32>
    %cst_81 = arith.constant 0.000000e+00 : f32
    %210 = vector.broadcast %cst_81 : f32 to vector<8x512xf32>
    %211 = arith.subf %210, %189 : vector<8x512xf32>
    %212 = arith.mulf %211, %189 : vector<8x512xf32>
    %213 = math.exp %212 : vector<8x512xf32>
    %214 = arith.mulf %209, %213 : vector<8x512xf32>
    %cst_82 = arith.constant 1.000000e+00 : f32
    %215 = vector.broadcast %cst_82 : f32 to vector<8x512xf32>
    %216 = arith.subf %215, %214 : vector<8x512xf32>
    %217 = arith.mulf %188, %216 : vector<8x512xf32>
    %cst_83 = arith.constant 1.000000e+00 : f32
    %218 = vector.broadcast %cst_83 : f32 to vector<8x512xf32>
    %219 = arith.addf %218, %217 : vector<8x512xf32>
    %220 = arith.mulf %181, %219 : vector<8x512xf32>
    %c0_84 = arith.constant 0 : index
    %c0_85 = arith.constant 0 : index
    %221 = vector.load %arg14[%c0_84, %c0_85] : memref<8x512xf32, #tpu.memory_space<vmem>>, vector<8x512xf32>
    tpu.vector_store %arg14[%c0_84, %c0_85], %220 {strides = array<i32>} : memref<8x512xf32, #tpu.memory_space<vmem>>, vector<8x512xf32>,
    return
  }
  func.func @transform_0(%arg0: i32) -> (i32, i32) {
    %c0_i32 = arith.constant 0 : i32
    %c0_i32_0 = arith.constant 0 : i32
    return %c0_i32, %arg0 : i32, i32
  }
  func.func @transform_1(%arg0: i32) -> (i32, i32) {
    %c0_i32 = arith.constant 0 : i32
    %c0_i32_0 = arith.constant 0 : i32
    %c0_i32_1 = arith.constant 0 : i32
    return %c0_i32, %c0_i32_0 : i32, i32
  }
  func.func @transform_2(%arg0: i32) -> (i32, i32) {
    %c0_i32 = arith.constant 0 : i32
    %c0_i32_0 = arith.constant 0 : i32
    %c0_i32_1 = arith.constant 0 : i32
    return %c0_i32, %c0_i32_0 : i32, i32
  }
  func.func @transform_3(%arg0: i32) -> (i32, i32) {
    %c0_i32 = arith.constant 0 : i32
    %c0_i32_0 = arith.constant 0 : i32
    %c0_i32_1 = arith.constant 0 : i32
    return %c0_i32, %c0_i32_0 : i32, i32
  }
  func.func @transform_4(%arg0: i32) -> (i32, i32) {
    %c0_i32 = arith.constant 0 : i32
    %c0_i32_0 = arith.constant 0 : i32
    %c0_i32_1 = arith.constant 0 : i32
    return %c0_i32, %c0_i32_0 : i32, i32
  }
  func.func @transform_5(%arg0: i32) -> (i32, i32) {
    %c0_i32 = arith.constant 0 : i32
    %c0_i32_0 = arith.constant 0 : i32
    %c0_i32_1 = arith.constant 0 : i32
    return %c0_i32, %c0_i32_0 : i32, i32
  }
  func.func @transform_6(%arg0: i32) -> (i32, i32) {
    %c0_i32 = arith.constant 0 : i32
    %c0_i32_0 = arith.constant 0 : i32
    %c0_i32_1 = arith.constant 0 : i32
    return %c0_i32, %c0_i32_0 : i32, i32
  }
  func.func @transform_7(%arg0: i32) -> (i32, i32) {
    %c0_i32 = arith.constant 0 : i32
    %c0_i32_0 = arith.constant 0 : i32
    %c0_i32_1 = arith.constant 0 : i32
    return %c0_i32, %c0_i32_0 : i32, i32
  }
  func.func @transform_8(%arg0: i32) -> (i32, i32) {
    %c0_i32 = arith.constant 0 : i32
    %c0_i32_0 = arith.constant 0 : i32
    %c0_i32_1 = arith.constant 0 : i32
    return %c0_i32, %c0_i32_0 : i32, i32
  }
  func.func @transform_9(%arg0: i32) -> (i32, i32) {
    %c0_i32 = arith.constant 0 : i32
    %c0_i32_0 = arith.constant 0 : i32
    %c0_i32_1 = arith.constant 0 : i32
    return %c0_i32, %c0_i32_0 : i32, i32
  }
  func.func @transform_10(%arg0: i32) -> (i32, i32) {
    %c0_i32 = arith.constant 0 : i32
    %c0_i32_0 = arith.constant 0 : i32
    %c0_i32_1 = arith.constant 0 : i32
    return %c0_i32, %c0_i32_0 : i32, i32
  }
  func.func @transform_11(%arg0: i32) -> (i32, i32) {
    %c0_i32 = arith.constant 0 : i32
    %c0_i32_0 = arith.constant 0 : i32
    %c0_i32_1 = arith.constant 0 : i32
    return %c0_i32, %c0_i32_0 : i32, i32
  }
  func.func @transform_12(%arg0: i32) -> (i32, i32) {
    %c0_i32 = arith.constant 0 : i32
    %c0_i32_0 = arith.constant 0 : i32
    %c0_i32_1 = arith.constant 0 : i32
    return %c0_i32, %c0_i32_0 : i32, i32
  }
  func.func @transform_13(%arg0: i32) -> (i32, i32) {
    %c0_i32 = arith.constant 0 : i32
    %c0_i32_0 = arith.constant 0 : i32
    return %c0_i32, %arg0 : i32, i32
  }
}

</mosaic_0001>

<bundles_post_ra>
// kernel: tpu_custom_call.1
= control target key start
LH: loop header
LB: loop body
LE: loop exit
PB: predicated region body
PF: predicated region fallthrough
CT: control target
= control target key end

     0   :  { %s1994_s29 = smov 112   ;;  %s1995_s30 = smov 111   ;;  %s3769_s0 = inlined_call_operand.vmem [shape: f32[8,512], index: 0, kind: input, shape index: {}]   ;;  %s3770_s1 = inlined_call_operand.vmem [shape: f32[9,512], index: 1, kind: input, shape index: {}]   ;;  %s3771_s2 = inlined_call_operand.vmem [shape: f32[512,2], index: 2, kind: input, shape index: {}]   ;;  %s3772_s3 = inlined_call_operand.vmem [shape: f32[2,512], index: 3, kind: input, shape index: {}]   ;;  %s3773_s4 = inlined_call_operand.vmem [shape: f32[8,8], index: 4, kind: input, shape index: {}]   ;;  %s3774_s5 = inlined_call_operand.vmem [shape: f32[8,72], index: 5, kind: input, shape index: {}]   ;;  %s3775_s6 = inlined_call_operand.vmem [shape: f32[8,1], index: 6, kind: input, shape index: {}]   ;;  %s3776_s7 = inlined_call_operand.vmem [shape: f32[8,1], index: 7, kind: input, shape index: {}]   ;;  %s3777_s8 = inlined_call_operand.vmem [shape: f32[8,1], index: 8, kind: input, shape index: {}]   ;;  %s3778_s9 = inlined_call_operand.vmem [shape: f32[8,72], index: 9, kind: input, shape index: {}]   ;;  %s3779_s10 = inlined_call_operand.vmem [shape: f32[8,1], index: 10, kind: input, shape index: {}]   ;;  %s3780_s11 = inlined_call_operand.vmem [shape: f32[8,1], index: 11, kind: input, shape index: {}]   ;;  %s3781_s12 = inlined_call_operand.vmem [shape: f32[8,1], index: 12, kind: input, shape index: {}]   ;;  %s3782_s13 = inlined_call_operand.hbm [shape: f32[8,512], index: 13, kind: output, shape index: {}]  }
   0x1   :  { %v2080_v0 = vld [vmem:[%s3769_s0 + $0x10] sm:$0xff]  ;;  %v2085_v1 = vld [vmem:[%s3769_s0] sm:$0xff] }
   0x2   :  { %256 = vrot.lane.b32.xlu1 %v2080_v0, %s1994_s29  ;;  %277 = vrot.lane.b32.xlu0 %v2080_v0, %s1995_s30 }
   0x3   :  { %273 = vrot.lane.b32.xlu2 %v2085_v1, %s1995_s30 }
   0x4   :  { %18 = vsyncpa [#allocation3], 0  ;;  %v2096_v2 = vld [vmem:[%s3769_s0 + $0x18] sm:$0xff]  ;;  %s1996_s16 = smov 113   ;;  %s1997_s17 = smov 127   ;;  %v2119_v3 = vld [vmem:[%s3769_s0 + $0x8] sm:$0xff]  ;;  %v132_v7 = vlaneseq }
   0x5   :  { %s1998_s20 = smov 1   ;;  %s1999_s21 = smov 15   ;;  %v2174_v12 = vld [vmem:[%s3770_s1 + $0x10] sm:$0xff]  ;;  %v1862_v14 = vld [vmem:[%s3770_s1 + $0x38] ss:$0 sm:$0xff]  ;;  %vm3814_vm8 = vcmask 588800  }
   0x6   :  { %s2000_s0 = smov 16   ;;  %s2001_s22 = smov 17   ;;  %v2169_v11 = vand.u32 127, %v132_v7  ;;  %v1861_v13 = vld [vmem:[%s3770_s1 + $0x30] ss:$0 sm:$0xff]  ;;  %v3806_v19 = vperm.slane %v2174_v12, 7 }
   0x7   :  { %v1859_v15 = vld [vmem:[%s3770_s1 + $0x20] ss:$0 sm:$0xff]  ;;  %v1860_v16 = vld [vmem:[%s3770_s1 + $0x28] ss:$0 sm:$0xff]  ;;  %v2205_v30 = vld [vmem:[%s3770_s1 + $0x18] sm:$0xff]  ;;  %v3804_v32 = vperm.slane %v2174_v12, 6 }
   0x8   :  { %vm260_vm0 = vcmp.lt.s32.totalorder %v2169_v11, 112  ;;  %vm281_vm1 = vcmp.lt.s32.totalorder %v2169_v11, 111  ;;  %vm239_vm2 = vcmp.lt.s32.totalorder %v2169_v11, 113  ;;  %v3810_v33 = vperm.slane %v2205_v30, 7  ;;  %v2277_v7 = vld [vmem:[%s3770_s1] sm:$0xff]  ;;  %s1792_s23 = sshll.u32 %s3782_s13, 4  ;;  %s1793_s23 = int_to_ptr.hbm [resolvable:$true] %s1792_s23 }
   0x9   :  { %vm218_vm3 = vcmp.lt.s32.totalorder %v2169_v11, 127  ;;  %v3802_v40 = vperm.slane %v2174_v12, 5  ;;  %v3808_v41 = vperm.slane %v2205_v30, 6  ;;  %v3799_v45 = vperm.slane %v2205_v30, 5 }
   0xa   :  { %258 = vrot.lane.b32.xlu1 %v2096_v2, %s1994_s29  ;;  %279 = vrot.lane.b32.xlu0 %v2096_v2, %s1995_s30  ;;  %vm197_vm4 = vcmp.lt.s32.totalorder %v2169_v11, 1  ;;  %v3796_v52 = vperm.slane %v2174_v12, 3  ;;  %v3789_v53 = vperm.slane %v2205_v30, 3  ;;  %vm176_vm5 = vcmp.lt.s32.totalorder %v2169_v11, 15 }
   0xb   :  { %235 = vrot.lane.b32.xlu2 %v2080_v0, %s1996_s16  ;;  %v3795_v61 = vperm.slane %v2174_v12, 2  ;;  %vm155_vm6 = vcmp.lt.s32.totalorder %v2169_v11, 16  ;;  %vm134_vm7 = vcmp.lt.s32.totalorder %v2169_v11, 17  ;;  %vm3813_vm9 = vcmask 15360  }
   0xc   :  { %vm3812_vm10 = vcmask 64512   ;;  %vm3811_vm11 = vcmask 1041408   ;;  %v3844_v11 = vperm.slane %v2205_v30, 0 }
  0x12   :  { %237 = vrot.lane.b32.xlu0 %v2096_v2, %s1996_s16  ;;  %252 = vrot.lane.b32.xlu1 %v2085_v1, %s1994_s29 }
  0x13   :  { %214 = vrot.lane.b32.xlu2 %v2080_v0, %s1997_s17 }
  0x1a   :  { %216 = vrot.lane.b32.xlu0 %v2096_v2, %s1997_s17  ;;  %231 = vrot.lane.b32.xlu1 %v2085_v1, %s1996_s16 }
  0x1b   :  { %210 = vrot.lane.b32.xlu2 %v2085_v1, %s1997_s17 }
  0x22   :  { %191 = vrot.lane.b32.xlu0 %v2119_v3, %s1998_s20  ;;  %193 = vrot.lane.b32.xlu1 %v2080_v0, %s1998_s20 }
  0x23   :  { %275 = vrot.lane.b32.xlu2 %v2119_v3, %s1995_s30 }
  0x2a   :  { %170 = vrot.lane.b32.xlu0 %v2119_v3, %s1999_s21  ;;  %172 = vrot.lane.b32.xlu1 %v2080_v0, %s1999_s21 }
  0x2b   :  { %195 = vrot.lane.b32.xlu2 %v2096_v2, %s1998_s20 }
  0x32   :  { %254 = vrot.lane.b32.xlu0 %v2119_v3, %s1994_s29  ;;  %149 = vrot.lane.b32.xlu1 %v2119_v3, %s2000_s0 }
  0x33   :  { %151 = vrot.lane.b32.xlu2 %v2080_v0, %s2000_s0 }
  0x3a   :  { %174 = vrot.lane.b32.xlu0 %v2096_v2, %s1999_s21  ;;  %233 = vrot.lane.b32.xlu1 %v2119_v3, %s1996_s16 }
  0x3b   :  { %126 = vrot.lane.b32.xlu2 %v2119_v3, %s2001_s22 }
  0x42   :  { %128 = vrot.lane.b32.xlu0 %v2080_v0, %s2001_s22  ;;  %153 = vrot.lane.b32.xlu1 %v2096_v2, %s2000_s0 }
  0x43   :  { %212 = vrot.lane.b32.xlu2 %v2119_v3, %s1997_s17 }
  0x4a   :  { %130 = vrot.lane.b32.xlu0 %v2096_v2, %s2001_s22  ;;  %189 = vrot.lane.b32.xlu1 %v2085_v1, %s1998_s20 }
  0x4b   :  { %168 = vrot.lane.b32.xlu2 %v2085_v1, %s1999_s21 }
  0x52   :  { %147 = vrot.lane.b32.xlu0 %v2085_v1, %s2000_s0  ;;  %124 = vrot.lane.b32.xlu1 %v2085_v1, %s2001_s22 }
  0x5d   :  { %v274_v4 = vpop.permute.xlu2 %273 }
  0x65   :  { %v2161_v5 = vpop.permute.xlu2 %235 }
  0x6d   :  { %v2163_v6 = vpop.permute.xlu2 %214 }
  0x74   :  { %v2165_v8 = vpop.permute.xlu1 %256  ;;  %v278_v9 = vpop.permute.xlu0 %277 }
  0x75   :  { %v2167_v10 = vpop.permute.xlu2 %210 }
  0x7c   :  { %v259_v17 = vpop.permute.xlu1 %258  ;;  %v280_v18 = vpop.permute.xlu0 %279 }
  0x7d   :  { %v261_v20 = vsel %vm260_vm0, %v2165_v8, %v259_v17  ;;  %v276_v21 = vpop.permute.xlu2 %275  ;;  %v282_v22 = vsel %vm281_vm1, %v278_v9, %v280_v18  ;;  %v285_v23 = vsel %vm281_vm1, %v280_v18, %v274_v4 }
  0x7e   :  { %v284_v24 = vsel %vm281_vm1, %v274_v4, %v276_v21  ;;  %v283_v25 = vsel %vm281_vm1, %v276_v21, %v278_v9  ;;  %v292_v26 = vmul.f32 %v1861_v13, %v282_v22  ;;  %v293_v27 = vmul.f32 %v1862_v14, %v285_v23  ;;  %v2282_v9 = vld [vmem:[%s3770_s1 + $0x8] sm:$0xff] }
  0x7f   :  { %v290_v28 = vmul.f32 %v1859_v15, %v284_v24  ;;  %v291_v29 = vmul.f32 %v1860_v16, %v283_v25  ;;  %v271_v31 = vmul.f32 %v3806_v19, %v261_v20  ;;  %v3809_v13 = vperm.slane %v2277_v7, 7  ;;  %v2741_v19 = vld [vmem:[%s3771_s2 + $0xa0] sm:$0xff] }
  0x80   :  { %351 = vmatpush.msra.mxu2 %v292_v26  ;;  %371 = vmatpush.msra.mxu3 %v293_v27  ;;  %v3805_v14 = vperm.slane %v2282_v9, 7  ;;  %v3793_v15 = vperm.slane %v2174_v12, 1  ;;  %v3807_v25 = vperm.slane %v2277_v7, 6  ;;  %v3803_v26 = vperm.slane %v2282_v9, 6 }
  0x81   :  { %311 = vmatpush.msra.mxu0 %v290_v28  ;;  %331 = vmatpush.msra.mxu1 %v291_v29  ;;  %v3787_v27 = vperm.slane %v2205_v30, 2  ;;  %v294_v28 = vld [vmem:[%s3775_s6] sm:$0xff] }
  0x82   :  { %352 = vmatpush.msra.mxu2 %v271_v31 }
  0x84   :  { %v238_v34 = vpop.permute.xlu0 %237  ;;  %v253_v35 = vpop.permute.xlu1 %252 }
  0x85   :  { %v240_v36 = vsel %vm239_vm2, %v2161_v5, %v238_v34  ;;  %v264_v37 = vsel %vm260_vm0, %v259_v17, %v253_v35  ;;  %v2224_v42 = vpop.permute.xlu2 %195 }
  0x86   :  { %v250_v38 = vmul.f32 %v3804_v32, %v240_v36  ;;  %v272_v39 = vmul.f32 %v3810_v33, %v264_v37  ;;  %v3801_v36 = vperm.slane %v2282_v9, 5  ;;  %v2002_v37 = vmov 0   ;;  %v2730_v32 = vld [vmem:[%s3771_s2 + $0x188] sm:$0xff] }
  0x87   :  { %1856 = vset.pattern.permute.xlu2 %v2002_v37  ;;  %1857 = vset.pattern.permute.xlu1 %v2002_v37  ;;  %v2789_v33 = vld [vmem:[%s3771_s2 + $0x88] sm:$0xff] }
  0x88   :  { %353 = vmatpush.msra.mxu2 %v250_v38  ;;  %372 = vmatpush.msra.mxu3 %v272_v39 }
  0x89   :  { %297 = vperm.xlu2 %1856, %v294_v28   ;;  %1858 = vset.pattern.permute.xlu0 %v2002_v37 }
  0x8c   :  { %v217_v43 = vpop.permute.xlu0 %216  ;;  %v2226_v44 = vpop.permute.xlu1 %231 }
  0x8d   :  { %v219_v46 = vsel %vm218_vm3, %v2163_v6, %v217_v43  ;;  %v222_v47 = vsel %vm218_vm3, %v217_v43, %v2167_v10  ;;  %v243_v48 = vsel %vm239_vm2, %v238_v34, %v2226_v44  ;;  %v2251_v56 = vpop.permute.xlu2 %151 }
  0x8e   :  { %v229_v49 = vmul.f32 %v3802_v40, %v219_v46  ;;  %v251_v50 = vmul.f32 %v3808_v41, %v243_v48  ;;  %v230_v51 = vmul.f32 %v3799_v45, %v222_v47  ;;  %v2697_v45 = vld [vmem:[%s3771_s2 + $0x30] sm:$0xff]  ;;  %v2716_v40 = vld [vmem:[%s3771_s2 + $0x28] sm:$0xff]  ;;  %v2760_v41 = vld [vmem:[%s3771_s2 + $0x98] sm:$0xff] }
  0x90   :  { %354 = vmatpush.msra.mxu2 %v229_v49  ;;  %373 = vmatpush.msra.mxu3 %v251_v50  ;;  %v3785_v49 = vperm.slane %v2205_v30, 1  ;;  %v384_v50 = vld [vmem:[%s3776_s7] sm:$0xff]  ;;  %s2003_s7 = smov 2  }
  0x91   :  { %601 = vperm.xlu2 %1856, %v384_v50   ;;  %v3784_v50 = vperm.slane %v2277_v7, 0 }
  0x92   :  { %374 = vmatpush.msra.mxu3 %v230_v51  ;;  %355 = vmatpush.msra.mxu2 %v2080_v0 }
  0x94   :  { %v2248_v54 = vpop.permute.xlu0 %191  ;;  %v194_v55 = vpop.permute.xlu1 %193  ;;  %375 = vmatpush.msra.mxu3 %v2096_v2 }
  0x95   :  { %v198_v57 = vsel %vm197_vm4, %v194_v55, %v2224_v42  ;;  %v199_v58 = vsel %vm197_vm4, %v2248_v54, %v194_v55  ;;  %v2272_v4 = vpop.permute.xlu2 %126 }
  0x96   :  { %v208_v59 = vmul.f32 %v3796_v52, %v199_v58  ;;  %v209_v60 = vmul.f32 %v3789_v53, %v198_v57  ;;  %v2639_v53 = vld [vmem:[%s3771_s2 + $0x110] sm:$0xff]  ;;  %v2678_v52 = vld [vmem:[%s3771_s2 + $0xb8] sm:$0xff] }
  0x98   :  { %356 = vmatpush.msra.mxu2 %v208_v59  ;;  %376 = vmatpush.msra.mxu3 %v209_v60 }
  0x9c   :  { %v2265_v62 = vpop.permute.xlu0 %170  ;;  %v173_v63 = vpop.permute.xlu1 %172 }
  0x9d   :  { %v178_v0 = vsel %vm176_vm5, %v2265_v62, %v173_v63 }
  0x9e   :  { %v187_v2 = vmul.f32 %v3795_v61, %v178_v0  ;;  %v3798_v0 = vperm.slane %v2282_v9, 3  ;;  %v2673_v61 = vld [vmem:[%s3771_s2 + $0x38] sm:$0xff] }
  0xa0   :  { %357 = vmatpush.msra.mxu2 %v187_v2  ;;  %v3783_v2 = vperm.slane %v2205_v30, 0 }
  0xa4   :  { %v255_v16 = vpop.permute.xlu0 %254  ;;  %v2288_v17 = vpop.permute.xlu1 %149 }
  0xa5   :  { %v262_v18 = vsel %vm260_vm0, %v255_v16, %v2165_v8  ;;  %v263_v20 = vsel %vm260_vm0, %v253_v35, %v255_v16  ;;  %v157_v21 = vsel %vm155_vm6, %v2288_v17, %v2251_v56  ;;  %v213_v8 = vpop.permute.xlu2 %212  ;;  %v3800_v35 = vperm.slane %v2277_v7, 5 }
  0xa6   :  { %v269_v22 = vmul.f32 %v3809_v13, %v263_v20  ;;  %v270_v23 = vmul.f32 %v3805_v14, %v262_v18  ;;  %v166_v24 = vmul.f32 %v3793_v15, %v157_v21  ;;  %v220_v29 = vsel %vm218_vm3, %v213_v8, %v2163_v6  ;;  %v2379_v18 = vld [vmem:[%s3771_s2 + $0x168] sm:$0xff]  ;;  %v2736_v14 = vld [vmem:[%s3771_s2 + $0x20] sm:$0xff]  ;;  %v2774_v13 = vld [vmem:[%s3771_s2 + $0x90] sm:$0xff] }
  0xa7   :  { %v221_v38 = vsel %vm218_vm3, %v2167_v10, %v213_v8  ;;  %v228_v48 = vmul.f32 %v3801_v36, %v220_v29  ;;  %v2663_v15 = vld [vmem:[%s3771_s2 + $0x108] sm:$0xff]  ;;  %v2711_v36 = vld [vmem:[%s3771_s2 + $0x190] sm:$0xff] }
  0xa8   :  { %312 = vmatpush.msra.mxu0 %v269_v22  ;;  %332 = vmatpush.msra.mxu1 %v270_v23  ;;  %v3788_v22 = vperm.slane %v2277_v7, 2  ;;  %v3797_v23 = vperm.slane %v2282_v9, 2 }
  0xa9   :  { %358 = vmatpush.msra.mxu2 %v166_v24 }
  0xac   :  { %v175_v31 = vpop.permute.xlu0 %174  ;;  %v234_v34 = vpop.permute.xlu1 %233 }
  0xad   :  { %v177_v39 = vsel %vm176_vm5, %v173_v63, %v175_v31  ;;  %v241_v6 = vsel %vm239_vm2, %v234_v34, %v2161_v5  ;;  %v242_v43 = vsel %vm239_vm2, %v2226_v44, %v234_v34  ;;  %v227_v5 = vmul.f32 %v3800_v35, %v221_v38  ;;  %v169_v16 = vpop.permute.xlu2 %168  ;;  %v2702_v35 = vld [vmem:[%s3771_s2 + $0xb0] sm:$0xff] }
  0xae   :  { %v248_v46 = vmul.f32 %v3807_v25, %v242_v43  ;;  %v249_v47 = vmul.f32 %v3803_v26, %v241_v6  ;;  %v188_v10 = vmul.f32 %v3787_v27, %v177_v39  ;;  %v3791_v44 = vperm.slane %v2174_v12, 0  ;;  %v2422_v6 = vld [vmem:[%s3771_s2 + $0x158] sm:$0xff]  ;;  %v2625_v27 = vld [vmem:[%s3771_s2 + $0x48] sm:$0xff] }
  0xaf   :  { %v3790_v63 = vperm.slane %v2277_v7, 3  ;;  %v180_v24 = vsel %vm176_vm5, %v175_v31, %v169_v16  ;;  %v179_v34 = vsel %vm176_vm5, %v169_v16, %v2265_v62  ;;  %v2414_v62 = vld [vmem:[%s3771_s2 + $0x1f8] sm:$0xff]  ;;  %v3786_v43 = vperm.slane %v2277_v7, 1  ;;  %v2721_v26 = vld [vmem:[%s3771_s2 + $0xa8] sm:$0xff] }
  0xb0   :  { %313 = vmatpush.msra.mxu0 %v248_v46  ;;  %333 = vmatpush.msra.mxu1 %v249_v47  ;;  %v186_v39 = vmul.f32 %v3797_v23, %v179_v34  ;;  %v3794_v46 = vperm.slane %v2282_v9, 1  ;;  %v2431_v47 = vld [vmem:[%s3771_s2 + $0x1f0] sm:$0xff]  ;;  %v2498_v34 = vld [vmem:[%s3771_s2 + $0x1d8] sm:$0xff]  ;;  %v2687_v23 = vld [vmem:[%s3771_s2 + $0x100] sm:$0xff] }
  0xb1   :  { %377 = vmatpush.msra.mxu3 %v188_v10  ;;  %v2437_v10 = vld [vmem:[%s3771_s2 + $0x150] sm:$0xff]  ;;  %v2755_v25 = vld [vmem:[%s3771_s2 + $0x18] sm:$0xff] }
  0xb2   :  { %314 = vmatpush.msra.mxu0 %v227_v5  ;;  %334 = vmatpush.msra.mxu1 %v228_v48 }
  0xb4   :  { %v129_v51 = vpop.permute.xlu0 %128  ;;  %v154_v55 = vpop.permute.xlu1 %153  ;;  %315 = vmatpush.msra.mxu0 %v2085_v1  ;;  %335 = vmatpush.msra.mxu1 %v2119_v3  ;;  %v2358_v1 = vld [vmem:[%s3774_s5] sm:$0xff]  ;;  %v2363_v3 = vld [vmem:[%s3771_s2 + $0x178] sm:$0xff] }
  0xb5   :  { %v136_v57 = vsel %vm134_vm7, %v2272_v4, %v129_v51  ;;  %v156_v58 = vsel %vm155_vm6, %v2251_v56, %v154_v55  ;;  %v2370_v56 = vld [vmem:[%s3771_s2 + $0x170] sm:$0xff] }
  0xb6   :  { %v145_v59 = vmul.f32 %v3791_v44, %v136_v57  ;;  %v167_v60 = vmul.f32 %v3785_v49, %v156_v58  ;;  %v2445_v57 = vld [vmem:[%s3771_s2 + $0x1e8] sm:$0xff]  ;;  %v2615_v49 = vld [vmem:[%s3771_s2 + $0x118] sm:$0xff]  ;;  %v2649_v44 = vld [vmem:[%s3771_s2 + $0x40] sm:$0xff] }
  0xb8   :  { %359 = vmatpush.msra.mxu2 %v145_v59  ;;  %378 = vmatpush.msra.mxu3 %v167_v60 }
  0xb9   :  { %1803 = vmatmul.msk.f32.vlgmr.msra.gmra.mxu2 %vm3814_vm8, %v2358_v1 }
  0xba   :  { %426 = vmatpush.msrb.mxu2 %v2363_v3 }
  0xbc   :  { %v131_v20 = vpop.permute.xlu0 %130  ;;  %v190_v21 = vpop.permute.xlu1 %189  ;;  %427 = vmatpush.msrb.mxu2 %v2370_v56 }
  0xbd   :  { %v135_v8 = vsel %vm134_vm7, %v129_v51, %v131_v20  ;;  %v200_v28 = vsel %vm197_vm4, %v190_v21, %v2248_v54  ;;  %v201_v29 = vsel %vm197_vm4, %v2224_v42, %v190_v21  ;;  %v2407_v54 = vld [vmem:[%s3771_s2 + $0x160] sm:$0xff]  ;;  %v185_v42 = vmul.f32 %v3788_v22, %v180_v24  ;;  %v2630_v22 = vld [vmem:[%s3771_s2 + $0xc8] sm:$0xff] }
  0xbe   :  { %v206_v37 = vmul.f32 %v3790_v63, %v201_v29  ;;  %v207_v31 = vmul.f32 %v3798_v0, %v200_v28  ;;  %v146_v38 = vmul.f32 %v3783_v2, %v135_v8  ;;  %428 = vmatpush.msrb.mxu2 %v2379_v18  ;;  %v3792_v51 = vperm.slane %v2282_v9, 0  ;;  %v2481_v8 = vld [vmem:[%s3771_s2 + $0x78] sm:$0xff]  ;;  %v2493_v29 = vld [vmem:[%s3771_s2 + $0x140] sm:$0xff]  ;;  %v2601_v2 = vld [vmem:[%s3771_s2 + $0x50] sm:$0xff] }
  0xbf   :  { %v2486_v28 = vld [vmem:[%s3771_s2 + $0xf8] sm:$0xff]  ;;  %v2644_v63 = vld [vmem:[%s3771_s2 + $0x1a8] sm:$0xff] }
  0xc0   :  { %316 = vmatpush.msra.mxu0 %v206_v37  ;;  %336 = vmatpush.msra.mxu1 %v207_v31  ;;  %v2507_v37 = vld [vmem:[%s3771_s2 + $0x70] sm:$0xff]  ;;  %v2692_v0 = vld [vmem:[%s3771_s2 + $0x198] sm:$0xff] }
  0xc1   :  { %379 = vmatpush.msra.mxu3 %v146_v38  ;;  %429 = vmatpush.msrb.mxu2 %v2407_v54  ;;  %v2512_v31 = vld [vmem:[%s3771_s2 + $0xf0] sm:$0xff]  ;;  %v2519_v38 = vld [vmem:[%s3771_s2 + $0x138] sm:$0xff] }
  0xc2   :  { %1804 = vmatmul.msk.f32.vlgmr.msra.gmra.mxu3 %vm3814_vm8, %v2358_v1  ;;  %317 = vmatpush.msra.mxu0 %v185_v42  ;;  %v2529_v42 = vld [vmem:[%s3771_s2 + $0x68] sm:$0xff] }
  0xc3   :  { %337 = vmatpush.msra.mxu1 %v186_v39  ;;  %446 = vmatpush.msrb.mxu3 %v2414_v62  ;;  %v2534_v39 = vld [vmem:[%s3771_s2 + $0xe8] sm:$0xff] }
  0xc4   :  { %v148_v5 = vpop.permute.xlu0 %147  ;;  %v125_v48 = vpop.permute.xlu1 %124  ;;  %430 = vmatpush.msrb.mxu2 %v2422_v6 }
  0xc5   :  { %v158_v58 = vsel %vm155_vm6, %v148_v5, %v2288_v17  ;;  %v159_v59 = vsel %vm155_vm6, %v154_v55, %v148_v5  ;;  %v137_v60 = vsel %vm134_vm7, %v125_v48, %v2272_v4  ;;  %v138_v16 = vsel %vm134_vm7, %v131_v20, %v125_v48  ;;  %447 = vmatpush.msrb.mxu3 %v2431_v47  ;;  %v2466_v17 = vld [vmem:[%s3771_s2 + $0x148] sm:$0xff]  ;;  %v2471_v4 = vld [vmem:[%s3771_s2 + $0x1e0] sm:$0xff]  ;;  %v2543_v5 = vld [vmem:[%s3771_s2 + $0x130] sm:$0xff] }
  0xc6   :  { %v164_v21 = vmul.f32 %v3786_v43, %v159_v59  ;;  %v165_v24 = vmul.f32 %v3794_v46, %v158_v58  ;;  %431 = vmatpush.msrb.mxu2 %v2437_v10  ;;  %v143_v55 = vmul.f32 %v3784_v50, %v138_v16  ;;  %v144_v20 = vmul.f32 %v3792_v51, %v137_v60  ;;  %v2548_v48 = vld [vmem:[%s3771_s2 + $0x1c8] sm:$0xff]  ;;  %v2553_v58 = vld [vmem:[%s3771_s2 + $0x60] sm:$0xff]  ;;  %v2606_v50 = vld [vmem:[%s3771_s2 + $0xd0] sm:$0xff] }
  0xc7   :  { %448 = vmatpush.msrb.mxu3 %v2445_v57  ;;  %v2558_v59 = vld [vmem:[%s3771_s2 + $0xe0] sm:$0xff]  ;;  %v2567_v60 = vld [vmem:[%s3771_s2 + $0x128] sm:$0xff]  ;;  %v2620_v43 = vld [vmem:[%s3771_s2 + $0x1b0] sm:$0xff] }
  0xc8   :  { %318 = vmatpush.msra.mxu0 %v164_v21  ;;  %338 = vmatpush.msra.mxu1 %v165_v24  ;;  %v2572_v16 = vld [vmem:[%s3771_s2 + $0x1c0] sm:$0xff]  ;;  %v2577_v21 = vld [vmem:[%s3771_s2 + $0x58] sm:$0xff] }
  0xc9   :  { %432 = vmatpush.msrb.mxu2 %v2466_v17  ;;  %449 = vmatpush.msrb.mxu3 %v2471_v4  ;;  %v2582_v24 = vld [vmem:[%s3771_s2 + $0xd8] sm:$0xff]  ;;  %v2654_v51 = vld [vmem:[%s3771_s2 + $0xc0] sm:$0xff] }
  0xca   :  { %319 = vmatpush.msra.mxu0 %v143_v55  ;;  %339 = vmatpush.msra.mxu1 %v144_v20  ;;  %v2591_v55 = vld [vmem:[%s3771_s2 + $0x120] sm:$0xff]  ;;  %v2596_v20 = vld [vmem:[%s3771_s2 + $0x1b8] sm:$0xff] }
  0xcb   :  { %1801 = vmatmul.msk.f32.vlgmr.msra.gmra.mxu0 %vm3814_vm8, %v2358_v1  ;;  %1802 = vmatmul.msk.f32.vlgmr.msra.gmra.mxu1 %vm3814_vm8, %v2358_v1  ;;  %v2524_v1 = vld [vmem:[%s3771_s2 + $0x1d0] sm:$0xff]  ;;  %v2668_v46 = vld [vmem:[%s3771_s2 + $0x1a0] sm:$0xff] }
  0xcc   :  { %386 = vmatpush.msrb.mxu0 %v2481_v8  ;;  %406 = vmatpush.msrb.mxu1 %v2486_v28 }
  0xcd   :  { %433 = vmatpush.msrb.mxu2 %v2493_v29  ;;  %450 = vmatpush.msrb.mxu3 %v2498_v34 }
  0xce   :  { %387 = vmatpush.msrb.mxu0 %v2507_v37  ;;  %407 = vmatpush.msrb.mxu1 %v2512_v31 }
  0xcf   :  { %434 = vmatpush.msrb.mxu2 %v2519_v38  ;;  %451 = vmatpush.msrb.mxu3 %v2524_v1 }
  0xd0   :  { %388 = vmatpush.msrb.mxu0 %v2529_v42  ;;  %408 = vmatpush.msrb.mxu1 %v2534_v39 }
  0xd1   :  { %435 = vmatpush.msrb.mxu2 %v2543_v5  ;;  %452 = vmatpush.msrb.mxu3 %v2548_v48 }
  0xd2   :  { %389 = vmatpush.msrb.mxu0 %v2553_v58  ;;  %409 = vmatpush.msrb.mxu1 %v2558_v59 }
  0xd3   :  { %436 = vmatpush.msrb.mxu2 %v2567_v60  ;;  %453 = vmatpush.msrb.mxu3 %v2572_v16 }
  0xd4   :  { %390 = vmatpush.msrb.mxu0 %v2577_v21  ;;  %410 = vmatpush.msrb.mxu1 %v2582_v24 }
  0xd5   :  { %437 = vmatpush.msrb.mxu2 %v2591_v55  ;;  %454 = vmatpush.msrb.mxu3 %v2596_v20 }
  0xd6   :  { %391 = vmatpush.msrb.mxu0 %v2601_v2  ;;  %411 = vmatpush.msrb.mxu1 %v2606_v50 }
  0xd7   :  { %438 = vmatpush.msrb.mxu2 %v2615_v49  ;;  %455 = vmatpush.msrb.mxu3 %v2620_v43 }
  0xd8   :  { %392 = vmatpush.msrb.mxu0 %v2625_v27  ;;  %412 = vmatpush.msrb.mxu1 %v2630_v22 }
  0xd9   :  { %439 = vmatpush.msrb.mxu2 %v2639_v53  ;;  %456 = vmatpush.msrb.mxu3 %v2644_v63 }
  0xda   :  { %393 = vmatpush.msrb.mxu0 %v2649_v44  ;;  %413 = vmatpush.msrb.mxu1 %v2654_v51 }
  0xdb   :  { %440 = vmatpush.msrb.mxu2 %v2663_v15  ;;  %457 = vmatpush.msrb.mxu3 %v2668_v46 }
  0xdc   :  { %394 = vmatpush.msrb.mxu0 %v2673_v61  ;;  %414 = vmatpush.msrb.mxu1 %v2678_v52 }
  0xdd   :  { %441 = vmatpush.msrb.mxu2 %v2687_v23  ;;  %458 = vmatpush.msrb.mxu3 %v2692_v0 }
  0xde   :  { %395 = vmatpush.msrb.mxu0 %v2697_v45  ;;  %415 = vmatpush.msrb.mxu1 %v2702_v35 }
  0xdf   :  { %510 = vmatpush.msra.mxu2 %v2363_v3  ;;  %459 = vmatpush.msrb.mxu3 %v2711_v36  ;;  %v2749_v3 = vld [vmem:[%s3771_s2 + $0x180] sm:$0xff] }
  0xe0   :  { %396 = vmatpush.msrb.mxu0 %v2716_v40  ;;  %416 = vmatpush.msrb.mxu1 %v2721_v26 }
  0xe1   :  { %511 = vmatpush.msra.mxu2 %v2370_v56  ;;  %460 = vmatpush.msrb.mxu3 %v2730_v32  ;;  %v2769_v56 = vld [vmem:[%s3771_s2 + $0x10] sm:$0xff] }
  0xe2   :  { %397 = vmatpush.msrb.mxu0 %v2736_v14  ;;  %417 = vmatpush.msrb.mxu1 %v2741_v19 }
  0xe3   :  { %512 = vmatpush.msra.mxu2 %v2379_v18  ;;  %461 = vmatpush.msrb.mxu3 %v2749_v3  ;;  %v2784_v18 = vld [vmem:[%s3771_s2 + $0x8] sm:$0xff] }
  0xe4   :  { %398 = vmatpush.msrb.mxu0 %v2755_v25  ;;  %418 = vmatpush.msrb.mxu1 %v2760_v41 }
  0xe5   :  { %513 = vmatpush.msra.mxu2 %v2407_v54  ;;  %530 = vmatpush.msra.mxu3 %v2414_v62  ;;  %v53_v54 = vld [vmem:[%s3771_s2] sm:$0xff] }
  0xe6   :  { %399 = vmatpush.msrb.mxu0 %v2769_v56  ;;  %419 = vmatpush.msrb.mxu1 %v2774_v13  ;;  %v69_v62 = vld [vmem:[%s3771_s2 + $0x80] sm:$0xff] }
  0xe7   :  { %514 = vmatpush.msra.mxu2 %v2422_v6  ;;  %531 = vmatpush.msra.mxu3 %v2431_v47 }
  0xe8   :  { %400 = vmatpush.msrb.mxu0 %v2784_v18  ;;  %420 = vmatpush.msrb.mxu1 %v2789_v33 }
  0xe9   :  { %515 = vmatpush.msra.mxu2 %v2437_v10  ;;  %532 = vmatpush.msra.mxu3 %v2445_v57  ;;  %v118_v10 = vld [vmem:[%s3773_s4] sm:$0xff] }
  0xea   :  { %401 = vmatpush.msrb.mxu0 %v53_v54  ;;  %421 = vmatpush.msrb.mxu1 %v69_v62 }
  0xeb   :  { %516 = vmatpush.msra.mxu2 %v2466_v17  ;;  %533 = vmatpush.msra.mxu3 %v2471_v4  ;;  %v385_v4 = vld [vmem:[%s3777_s8] sm:$0xff] }
  0xec   :  { %470 = vmatpush.msra.mxu0 %v2481_v8  ;;  %490 = vmatpush.msra.mxu1 %v2486_v28  ;;  %v2891_v8 = vld [vmem:[%s3772_s3] sm:$0xff]  ;;  %s2004_s3 = smov 126  }
  0xed   :  { %517 = vmatpush.msra.mxu2 %v2493_v29  ;;  %534 = vmatpush.msra.mxu3 %v2498_v34  ;;  %617 = vst [vmem:[#allocation1] ss:$4 sm:$0xff] %v2891_v8 }
  0xee   :  { %471 = vmatpush.msra.mxu0 %v2507_v37  ;;  %491 = vmatpush.msra.mxu1 %v2512_v31 }
  0xef   :  { %518 = vmatpush.msra.mxu2 %v2519_v38  ;;  %535 = vmatpush.msra.mxu3 %v2524_v1 }
  0xf0   :  { %472 = vmatpush.msra.mxu0 %v2529_v42  ;;  %492 = vmatpush.msra.mxu1 %v2534_v39 }
  0xf1   :  { %519 = vmatpush.msra.mxu2 %v2543_v5  ;;  %536 = vmatpush.msra.mxu3 %v2548_v48 }
  0xf2   :  { %473 = vmatpush.msra.mxu0 %v2553_v58  ;;  %493 = vmatpush.msra.mxu1 %v2558_v59 }
  0xf3   :  { %520 = vmatpush.msra.mxu2 %v2567_v60  ;;  %537 = vmatpush.msra.mxu3 %v2572_v16 }
  0xf4   :  { %474 = vmatpush.msra.mxu0 %v2577_v21  ;;  %494 = vmatpush.msra.mxu1 %v2582_v24  ;;  %v618_v37 = vld.sshfl [vmem:[#allocation1] sm:$0xff pattern:$0x73625140]  ;;  %v619_v31 = vld.sshfl [vmem:[#allocation1 + $0x8] sm:$0xff pattern:$0x73625140] }
  0xf5   :  { %521 = vmatpush.msra.mxu2 %v2591_v55  ;;  %538 = vmatpush.msra.mxu3 %v2596_v20  ;;  %v620_v38 = vld.sshfl [vmem:[#allocation1 + $0x10] sm:$0xff pattern:$0x73625140]  ;;  %v621_v42 = vld.sshfl [vmem:[#allocation1 + $0x18] sm:$0xff pattern:$0x73625140] }
  0xf6   :  { %475 = vmatpush.msra.mxu0 %v2601_v2  ;;  %495 = vmatpush.msra.mxu1 %v2606_v50  ;;  %713 = vst [vmem:[#allocation1] ss:$4 sm:$0xff] %v2891_v8 }
  0xf7   :  { %522 = vmatpush.msra.mxu2 %v2615_v49  ;;  %539 = vmatpush.msra.mxu3 %v2620_v43 }
  0xf8   :  { %476 = vmatpush.msra.mxu0 %v2625_v27  ;;  %496 = vmatpush.msra.mxu1 %v2630_v22 }
  0xf9   :  { %523 = vmatpush.msra.mxu2 %v2639_v53  ;;  %540 = vmatpush.msra.mxu3 %v2644_v63 }
  0xfa   :  { %477 = vmatpush.msra.mxu0 %v2649_v44  ;;  %497 = vmatpush.msra.mxu1 %v2654_v51 }
  0xfb   :  { %524 = vmatpush.msra.mxu2 %v2663_v15  ;;  %541 = vmatpush.msra.mxu3 %v2668_v46 }
  0xfc   :  { %478 = vmatpush.msra.mxu0 %v2673_v61  ;;  %498 = vmatpush.msra.mxu1 %v2678_v52 }
  0xfd   :  { %525 = vmatpush.msra.mxu2 %v2687_v23  ;;  %542 = vmatpush.msra.mxu3 %v2692_v0  ;;  %v714_v55 = vld.sshfl [vmem:[#allocation1] sm:$0xff pattern:$0x73625140]  ;;  %v715_v20 = vld.sshfl [vmem:[#allocation1 + $0x8] sm:$0xff pattern:$0x73625140] }
  0xfe   :  { %479 = vmatpush.msra.mxu0 %v2697_v45  ;;  %499 = vmatpush.msra.mxu1 %v2702_v35 }
  0xff   :  { %543 = vmatpush.msra.mxu3 %v2711_v36 }
 0x100   :  { %480 = vmatpush.msra.mxu0 %v2716_v40  ;;  %500 = vmatpush.msra.mxu1 %v2721_v26  ;;  %v298_v40 = vpop.permute.xlu2 %297 }
 0x101   :  { %544 = vmatpush.msra.mxu3 %v2730_v32 }
 0x102   :  { %481 = vmatpush.msra.mxu0 %v2736_v14  ;;  %501 = vmatpush.msra.mxu1 %v2741_v19 }
 0x103   :  { %545 = vmatpush.msra.mxu3 %v2749_v3  ;;  %v716_v3 = vld.sshfl [vmem:[#allocation1 + $0x10] sm:$0xff pattern:$0x73625140] }
 0x104   :  { %482 = vmatpush.msra.mxu0 %v2755_v25  ;;  %502 = vmatpush.msra.mxu1 %v2760_v41 }
 0x106   :  { %483 = vmatpush.msra.mxu0 %v2769_v56  ;;  %503 = vmatpush.msra.mxu1 %v2774_v13  ;;  %v717_v56 = vld.sshfl [vmem:[#allocation1 + $0x18] sm:$0xff pattern:$0x73625140] }
 0x107   :  { %1422 = vst [vmem:[#allocation1] ss:$4 sm:$0xff] %v2891_v8 }
 0x108   :  { %484 = vmatpush.msra.mxu0 %v2784_v18  ;;  %504 = vmatpush.msra.mxu1 %v2789_v33  ;;  %v602_v16 = vpop.permute.xlu2 %601 }
 0x10a   :  { %485 = vmatpush.msra.mxu0 %v53_v54  ;;  %505 = vmatpush.msra.mxu1 %v69_v62 }
 0x13c   :  { %v361_v19 = vpop.f32.mrf.mxu2 }
 0x13d   :  { %v2858_v45 = vadd.f32 %v361_v19, %v298_v40 }
 0x13f   :  { %442 = vmatmul.f32.vlgmr.msrb.gmra.mxu2 %v2858_v45  ;;  %v468_v32 = vmul.f32 %v2858_v45, %v2858_v45 }
 0x140   :  { %1808 = vmatpush.msk.msrb.mxu2 %vm3811_vm11, %v619_v31 }
 0x145   :  { %v381_v41 = vpop.f32.mrf.mxu3 }
 0x146   :  { %v2863_v52 = vadd.f32 %v381_v41, %v298_v40 }
 0x147   :  { %526 = vmatmul.f32.vlgmr.msra.gmra.mxu2 %v468_v32 }
 0x148   :  { %462 = vmatmul.f32.vlgmr.msrb.gmra.mxu3 %v2863_v52  ;;  %v321_v53 = vpop.f32.mrf.mxu0  ;;  %v341_v61 = vpop.f32.mrf.mxu1  ;;  %v469_v14 = vmul.f32 %v2863_v52, %v2863_v52  ;;  %1816 = vmatpush.msk.msra.mxu2 %vm3811_vm11, %v715_v20 }
 0x149   :  { %v2866_v33 = vadd.f32 %v321_v53, %v298_v40  ;;  %v2868_v13 = vadd.f32 %v341_v61, %v298_v40  ;;  %1810 = vmatpush.msk.msrb.mxu3 %vm3811_vm11, %v620_v38 }
 0x14b   :  { %402 = vmatmul.f32.vlgmr.msrb.gmra.mxu0 %v2866_v33  ;;  %422 = vmatmul.f32.vlgmr.msrb.gmra.mxu1 %v2868_v13  ;;  %v466_v15 = vmul.f32 %v2866_v33, %v2866_v33  ;;  %v467_v25 = vmul.f32 %v2868_v13, %v2868_v13 }
 0x14c   :  { %1806 = vmatpush.msk.msrb.mxu1 %vm3811_vm11, %v618_v37 }
 0x150   :  { %546 = vmatmul.f32.vlgmr.msra.gmra.mxu3 %v469_v14 }
 0x151   :  { %1818 = vmatpush.msk.msra.mxu3 %vm3811_vm11, %v716_v3 }
 0x153   :  { %486 = vmatmul.f32.vlgmr.msra.gmra.mxu0 %v466_v15  ;;  %506 = vmatmul.f32.vlgmr.msra.gmra.mxu1 %v467_v25 }
 0x154   :  { %1814 = vmatpush.msk.msra.mxu1 %vm3811_vm11, %v714_v55 }
 0x1c2   :  { %v443_v26 = vpop.f32.mrf.mxu2 }
 0x1c8   :  { %v403_v27 = vpop.f32.mrf.mxu0  ;;  %v423_v35 = vpop.f32.mrf.mxu1 }
 0x1c9   :  { %v424_v36 = vadd.f32 %v423_v35, %v403_v27 }
 0x1ca   :  { %v527_v23 = vpop.f32.mrf.mxu2 }
 0x1cb   :  { %v444_v44 = vadd.f32 %v443_v26, %v424_v36  ;;  %v463_v49 = vpop.f32.mrf.mxu3 }
 0x1cd   :  { %v464_v63 = vadd.f32 %v463_v49, %v444_v44 }
 0x1d0   :  { %v487_v0 = vpop.f32.mrf.mxu0  ;;  %v507_v2 = vpop.f32.mrf.mxu1 }
 0x1d1   :  { %v508_v22 = vadd.f32 %v507_v2, %v487_v0 }
 0x1d3   :  { %v528_v6 = vadd.f32 %v527_v23, %v508_v22  ;;  %v547_v43 = vpop.f32.mrf.mxu3 }
 0x1d5   :  { %v548_v46 = vadd.f32 %v547_v43, %v528_v6 }
 0x1d7   :  { %551 = vrot.lane.b32.xlu0 %v548_v46, %s2003_s7 }
 0x249   :  { %v552_v47 = vpop.permute.xlu0 %551 }
 0x24a   :  { %v555_v50 = vsel %vm3813_vm9, %v464_v63, %v552_v47 }
 0x24b   :  { %575 = vmatpush.msrb.mxu0 %v555_v50 }
 0x24c   :  { %1805 = vmatmul.msk.f32.vlgmr.msrb.gmra.mxu0 %vm3812_vm10, %v118_v10 }
 0x24d   :  { %1812 = vmatpush.msk.msra.mxu0 %vm3811_vm11, %v621_v42 }
 0x24f   :  { %1820 = vmatpush.msk.msrb.mxu0 %vm3811_vm11, %v717_v56 }
 0x2c9   :  { %v577_v51 = vpop.f32.mrf.mxu0 }
 0x2ca   :  { %v580_v57 = vmul.f32 0.0009765625, %v577_v51 }
 0x2cc   :  { %v581_v17 = vmul.f32 %v580_v57, %v580_v57 }
 0x2ce   :  { %583 = vrot.lane.b32.xlu1 %v581_v17, %s2003_s7 }
 0x2d6   :  { %612 = vperm.xlu1 %1857, %v385_v4  }
 0x340   :  { %v584_v28 = vpop.permute.xlu1 %583 }
 0x341   :  { %v586_v29 = vsub.f32 %v580_v57, %v584_v28 }
 0x343   :  { %v587_v34 = vmax.f32 %v586_v29, 0.0 }
 0x345   :  { %v588_v1 = vadd.f32 1e-05, %v587_v34 }
 0x347   :  { %1863 = vrsqrt.f32 %v588_v1  ;;  %vm595_vm13 = vweird.f32 %v588_v1 }
 0x348   :  { %v613_v62 = vpop.permute.xlu1 %612 }
 0x34d   :  { %v1864_v39 = vpop.eup %1863 }
 0x34e   :  { %v590_v5 = vmul.f32 %v1864_v39, %v588_v1  ;;  %vm596_vm12 = vweird.f32 %v1864_v39 }
 0x34f   :  { %vm597_vm14 = vmor %vm595_vm13, %vm596_vm12 }
 0x350   :  { %v591_v48 = vmul.f32 %v1864_v39, %v590_v5 }
 0x352   :  { %v592_v58 = vmul.f32 0.5, %v591_v48 }
 0x354   :  { %v593_v59 = vsub.f32 1.5, %v592_v58 }
 0x356   :  { %v594_v60 = vmul.f32 %v1864_v39, %v593_v59 }
 0x358   :  { %v598_v21 = vsel %vm597_vm14, %v1864_v39, %v594_v60 }
 0x359   :  { %v604_v24 = vmul.f32 %v602_v16, %v598_v21 }
 0x35b   :  { %606 = vrot.lane.b32.xlu0 %v604_v24, %s2004_s3 }
 0x3cd   :  { %v607_v18 = vpop.permute.xlu0 %606 }
 0x3ce   :  { %1807 = vmatmul.msk.f32.vlgmr.msrb.gmra.mxu1 %vm3813_vm9, %v607_v18  ;;  %1809 = vmatmul.msk.f32.vlgmr.msrb.gmra.mxu2 %vm3813_vm9, %v607_v18  ;;  %v609_v54 = vmul.f32 %v607_v18, %v580_v57 }
 0x3cf   :  { %1811 = vmatmul.msk.f32.vlgmr.msrb.gmra.mxu3 %vm3813_vm9, %v607_v18  ;;  %1813 = vmatmul.msk.f32.vlgmr.msra.gmra.mxu0 %vm3813_vm9, %v607_v18 }
 0x3d0   :  { %v615_v40 = vsub.f32 %v613_v62, %v609_v54 }
 0x3d6   :  { %1815 = vmatmul.msk.f32.vlgmr.msra.gmra.mxu1 %vm3813_vm9, %v615_v40  ;;  %1817 = vmatmul.msk.f32.vlgmr.msra.gmra.mxu2 %vm3813_vm9, %v615_v40 }
 0x3d7   :  { %1819 = vmatmul.msk.f32.vlgmr.msra.gmra.mxu3 %vm3813_vm9, %v615_v40  ;;  %1821 = vmatmul.msk.f32.vlgmr.msrb.gmra.mxu0 %vm3813_vm9, %v615_v40 }
 0x44b   :  { %v650_v19 = vpop.f32.mrf.mxu1 }
 0x44c   :  { %v710_v32 = vpop.f32.mrf.mxu0  ;;  %v809_v53 = vmul.f32 %v650_v19, %v2866_v33 }
 0x44d   :  { %v812_v14 = vmul.f32 %v710_v32, %v2863_v52 }
 0x451   :  { %v670_v41 = vpop.f32.mrf.mxu2 }
 0x452   :  { %v690_v61 = vpop.f32.mrf.mxu3  ;;  %v810_v44 = vmul.f32 %v670_v41, %v2868_v13 }
 0x453   :  { %v746_v15 = vpop.f32.mrf.mxu1  ;;  %v811_v33 = vmul.f32 %v690_v61, %v2858_v45 }
 0x454   :  { %v2915_v25 = vadd.f32 %v809_v53, %v746_v15  ;;  %v806_v26 = vpop.f32.mrf.mxu0 }
 0x455   :  { %v2917_v27 = vadd.f32 %v812_v14, %v806_v26 }
 0x456   :  { %v2920_v35 = vmul.f32 0.70710677, %v2915_v25 }
 0x457   :  { %v2923_v36 = vmul.f32 0.70710677, %v2917_v27 }
 0x458   :  { %v833_v49 = vand.u32 2147483647, %v2920_v35 }
 0x459   :  { %v2929_v52 = vand.u32 2147483647, %v2923_v36  ;;  %v766_v63 = vpop.f32.mrf.mxu2 }
 0x45a   :  { %v837_v0 = vmul.f32 0.3275911, %v833_v49  ;;  %v2931_v2 = vadd.f32 %v810_v44, %v766_v63  ;;  %v786_v22 = vpop.f32.mrf.mxu3  ;;  %v941_v59 = vsub.f32 0.0, %v833_v49 }
 0x45b   :  { %v840_v23 = vmul.f32 0.3275911, %v2929_v52  ;;  %v2934_v6 = vadd.f32 %v811_v33, %v786_v22  ;;  %v944_v40 = vsub.f32 0.0, %v2929_v52 }
 0x45c   :  { %v841_v43 = vadd.f32 1.0, %v837_v0  ;;  %v2937_v13 = vmul.f32 0.70710677, %v2931_v2  ;;  %v945_v54 = vmul.f32 %v941_v59, %v833_v49 }
 0x45d   :  { %v844_v46 = vadd.f32 1.0, %v840_v23  ;;  %v2940_v45 = vmul.f32 0.70710677, %v2934_v6  ;;  %v948_v0 = vmul.f32 %v944_v40, %v2929_v52 }
 0x45e   :  { %1865 = vrcp.f32 %v841_v43  ;;  %v2943_v47 = vand.u32 2147483647, %v2937_v13  ;;  %v856_v37 = vand.u32 2147483648, %v841_v43  ;;  %v854_v42 = vand.u32 2147483647, %v841_v43 }
 0x45f   :  { %1867 = vrcp.f32 %v844_v46  ;;  %v2947_v50 = vand.u32 2147483647, %v2940_v45  ;;  %v901_v39 = vand.u32 2147483648, %v844_v46  ;;  %v899_v48 = vand.u32 2147483647, %v844_v46 }
 0x460   :  { %v838_v10 = vmul.f32 0.3275911, %v2943_v47  ;;  %vm850_vm13 = vweird.f32 %v841_v43  ;;  %v857_v60 = vor.u32 1.1754944e-38, %v856_v37  ;;  %vm895_vm11 = vweird.f32 %v844_v46 }
 0x461   :  { %v839_v29 = vmul.f32 0.3275911, %v2947_v50  ;;  %vm855_vm10 = vcmp.eq.f32.partialorder %v854_v42, 8.507059e+37  ;;  %v902_v55 = vor.u32 1.1754944e-38, %v901_v39  ;;  %vm900_vm8 = vcmp.eq.f32.partialorder %v899_v48, 8.507059e+37 }
 0x462   :  { %v842_v4 = vadd.f32 1.0, %v838_v10  ;;  %v949_v63 = vmul.f32 1.442695, %v945_v54 }
 0x463   :  { %v2950_v38 = vadd.f32 1.0, %v839_v29 }
 0x464   :  { %v1866_v51 = vpop.eup %1865  ;;  %1869 = vrcp.f32 %v842_v4  ;;  %v869_v41 = vand.u32 2147483647, %v842_v4  ;;  %v871_v14 = vand.u32 2147483648, %v842_v4 }
 0x465   :  { %v1868_v57 = vpop.eup %1867  ;;  %v846_v17 = vmul.f32 %v1866_v51, %v841_v43  ;;  %vm851_vm15 = vweird.f32 %v1866_v51  ;;  %1871 = vrcp.f32 %v2950_v38  ;;  %v884_v10 = vand.u32 2147483647, %v2950_v38 }
 0x466   :  { %v891_v28 = vmul.f32 %v1868_v57, %v844_v46  ;;  %vm896_vm12 = vweird.f32 %v1868_v57  ;;  %vm852_vm14 = vmor %vm850_vm13, %vm851_vm15  ;;  %v872_v46 = vor.u32 1.1754944e-38, %v871_v14  ;;  %1873 = vpow2.f32 %v949_v63 }
 0x467   :  { %v847_v34 = vsub.f32 1.0, %v846_v17  ;;  %vm897_vm9 = vmor %vm895_vm11, %vm896_vm12  ;;  %vm880_vm12 = vweird.f32 %v2950_v38 }
 0x468   :  { %v892_v31 = vsub.f32 1.0, %v891_v28 }
 0x469   :  { %v848_v1 = vmul.f32 %v1866_v51, %v847_v34  ;;  %v955_v34 = vmul.f32 1.442695, %v948_v0 }
 0x46a   :  { %v893_v5 = vmul.f32 %v1868_v57, %v892_v31  ;;  %v1870_v21 = vpop.eup %1869 }
 0x46b   :  { %v849_v58 = vadd.f32 %v1866_v51, %v848_v1  ;;  %v861_v56 = vmul.f32 %v1870_v21, %v842_v4  ;;  %v1872_v53 = vpop.eup %1871  ;;  %vm866_vm15 = vweird.f32 %v1870_v21  ;;  %1875 = vpow2.f32 %v955_v34 }
 0x46c   :  { %v894_v16 = vadd.f32 %v1868_v57, %v893_v5  ;;  %v876_v44 = vmul.f32 %v1872_v53, %v2950_v38  ;;  %vm881_vm11 = vweird.f32 %v1872_v53 }
 0x46d   :  { %v853_v24 = vsel %vm852_vm14, %v1866_v51, %v849_v58  ;;  %v862_v32 = vsub.f32 1.0, %v861_v56  ;;  %v886_v51 = vand.u32 2147483648, %v2950_v38  ;;  %vm882_vm13 = vmor %vm880_vm12, %vm881_vm11  ;;  %vm885_vm14 = vcmp.eq.f32.partialorder %v884_v10, 8.507059e+37 }
 0x46e   :  { %v858_v20 = vsel %vm855_vm10, %v857_v60, %v853_v24  ;;  %v898_v3 = vsel %vm897_vm9, %v1868_v57, %v894_v16  ;;  %vm865_vm9 = vweird.f32 %v842_v4  ;;  %v877_v23 = vsub.f32 1.0, %v876_v44 }
 0x46f   :  { %v905_v18 = vmul.f32 1.0614054, %v858_v20  ;;  %v903_v62 = vsel %vm900_vm8, %v902_v55, %v898_v3  ;;  %v863_v26 = vmul.f32 %v1870_v21, %v862_v32  ;;  %vm870_vm8 = vcmp.eq.f32.partialorder %v869_v41, 8.507059e+37  ;;  %vm867_vm10 = vmor %vm865_vm9, %vm866_vm15 }
 0x470   :  { %v908_v19 = vmul.f32 1.0614054, %v903_v62  ;;  %v878_v28 = vmul.f32 %v1872_v53, %v877_v23  ;;  %v887_v42 = vor.u32 1.1754944e-38, %v886_v51  ;;  %v942_v55 = vsub.f32 0.0, %v2943_v47 }
 0x471   :  { %v909_v61 = vadd.f32 -1.4531521, %v905_v18  ;;  %v864_v22 = vadd.f32 %v1870_v21, %v863_v26  ;;  %v1874_v18 = vpop.eup %1873  ;;  %vm825_vm15 = vcmp.ge.f32.partialorder %v2920_v35, 0.0  ;;  %vm828_vm9 = vcmp.ge.f32.partialorder %v2923_v36, 0.0 }
 0x472   :  { %v912_v15 = vadd.f32 -1.4531521, %v908_v19  ;;  %v879_v31 = vadd.f32 %v1872_v53, %v878_v28  ;;  %v1876_v41 = vpop.eup %1875  ;;  %v817_v36 = vmul.f32 0.5, %v2915_v25 }
 0x473   :  { %v913_v33 = vmul.f32 %v909_v61, %v858_v20  ;;  %v868_v17 = vsel %vm867_vm10, %v1870_v21, %v864_v22  ;;  %vm827_vm10 = vcmp.ge.f32.partialorder %v2940_v45, 0.0  ;;  %v819_v45 = vmul.f32 0.5, %v2934_v6  ;;  %v1195_v6 = vld [vmem:[%s3780_s11] sm:$0xff] }
 0x474   :  { %v916_v49 = vmul.f32 %v912_v15, %v903_v62  ;;  %v873_v37 = vsel %vm870_vm8, %v872_v46, %v868_v17  ;;  %v883_v48 = vsel %vm882_vm13, %v1872_v53, %v879_v31  ;;  %v946_v15 = vmul.f32 %v942_v55, %v2943_v47 }
 0x475   :  { %v917_v43 = vadd.f32 1.4214138, %v913_v33  ;;  %v906_v4 = vmul.f32 1.0614054, %v873_v37  ;;  %v888_v59 = vsel %vm885_vm14, %v887_v42, %v883_v48  ;;  %v2005_v33 = vmov -1.0  }
 0x476   :  { %v920_v57 = vadd.f32 1.4214138, %v916_v49  ;;  %v907_v21 = vmul.f32 1.0614054, %v888_v59  ;;  %v829_v63 = vsel %vm825_vm15, 1.0, %v2005_v33  ;;  %v820_v47 = vmul.f32 0.5, %v2917_v27 }
 0x477   :  { %v921_v29 = vmul.f32 %v917_v43, %v858_v20  ;;  %v910_v5 = vadd.f32 -1.4531521, %v906_v4  ;;  %v951_v35 = vmul.f32 1.442695, %v946_v15  ;;  %v943_v43 = vsub.f32 0.0, %v2947_v50 }
 0x478   :  { %v924_v52 = vmul.f32 %v920_v57, %v903_v62  ;;  %v911_v38 = vadd.f32 -1.4531521, %v907_v21  ;;  %vm826_vm8 = vcmp.ge.f32.partialorder %v2937_v13, 0.0 }
 0x479   :  { %v925_v1 = vadd.f32 -0.28449672, %v921_v29  ;;  %v914_v16 = vmul.f32 %v910_v5, %v873_v37  ;;  %1877 = vpow2.f32 %v951_v35  ;;  %v947_v29 = vmul.f32 %v943_v43, %v2947_v50 }
 0x47a   :  { %v928_v39 = vadd.f32 -0.28449672, %v924_v52  ;;  %v915_v32 = vmul.f32 %v911_v38, %v888_v59  ;;  %v830_v42 = vsel %vm826_vm8, 1.0, %v2005_v33 }
 0x47b   :  { %v929_v58 = vmul.f32 %v925_v1, %v858_v20  ;;  %v918_v56 = vadd.f32 1.4214138, %v914_v16  ;;  %v953_v34 = vmul.f32 1.442695, %v947_v29 }
 0x47c   :  { %v932_v60 = vmul.f32 %v928_v39, %v903_v62  ;;  %v919_v26 = vadd.f32 1.4214138, %v915_v32 }
 0x47d   :  { %v933_v24 = vadd.f32 0.2548296, %v929_v58  ;;  %v922_v19 = vmul.f32 %v918_v56, %v873_v37  ;;  %1879 = vpow2.f32 %v953_v34  ;;  %v818_v58 = vmul.f32 0.5, %v2931_v2  ;;  %v1106_v2 = vld [vmem:[%s3779_s10] sm:$0xff] }
 0x47e   :  { %v936_v3 = vadd.f32 0.2548296, %v932_v60  ;;  %v923_v22 = vmul.f32 %v919_v26, %v888_v59  ;;  %v3818_v34 = vperm.slane %v2277_v7, 6 }
 0x47f   :  { %v937_v54 = vmul.f32 %v933_v24, %v858_v20  ;;  %v926_v14 = vadd.f32 -0.28449672, %v922_v19  ;;  %v1878_v52 = vpop.eup %1877 }
 0x480   :  { %v940_v40 = vmul.f32 %v936_v3, %v903_v62  ;;  %v832_v62 = vsel %vm828_vm9, 1.0, %v2005_v33  ;;  %v927_v17 = vadd.f32 -0.28449672, %v923_v22 }
 0x481   :  { %v957_v53 = vmul.f32 %v1874_v18, %v937_v54  ;;  %v930_v49 = vmul.f32 %v926_v14, %v873_v37 }
 0x482   :  { %v960_v61 = vmul.f32 %v1876_v41, %v940_v40  ;;  %v931_v27 = vmul.f32 %v927_v17, %v888_v59 }
 0x483   :  { %v961_v44 = vsub.f32 1.0, %v957_v53  ;;  %v934_v57 = vadd.f32 0.2548296, %v930_v49 }
 0x484   :  { %v964_v0 = vsub.f32 1.0, %v960_v61  ;;  %v935_v31 = vadd.f32 0.2548296, %v931_v27 }
 0x485   :  { %v965_v20 = vmul.f32 %v961_v44, %v829_v63  ;;  %v938_v25 = vmul.f32 %v934_v57, %v873_v37  ;;  %v1880_v37 = vpop.eup %1879  ;;  %v1899_v44 = vld [vmem:[%s3770_s1 + $0x20] ss:$0 sm:$0xff] }
 0x486   :  { %v968_v23 = vmul.f32 %v964_v0, %v832_v62  ;;  %v939_v1 = vmul.f32 %v935_v31, %v888_v59  ;;  %v831_v59 = vsel %vm827_vm10, 1.0, %v2005_v33  ;;  %v1900_v0 = vld [vmem:[%s3770_s1 + $0x38] ss:$0 sm:$0xff]  ;;  %v3815_v62 = vperm.slane %v2205_v30, 7 }
 0x487   :  { %v969_v46 = vadd.f32 1.0, %v965_v20  ;;  %v958_v4 = vmul.f32 %v1878_v52, %v938_v25  ;;  %v3817_v25 = vperm.slane %v2205_v30, 6 }
 0x488   :  { %v972_v10 = vadd.f32 1.0, %v968_v23  ;;  %v959_v5 = vmul.f32 %v1880_v37, %v939_v1 }
 0x489   :  { %v2968_v51 = vmul.f32 %v969_v46, %v817_v36  ;;  %v962_v50 = vsub.f32 1.0, %v958_v4  ;;  %v3816_v36 = vperm.slane %v2277_v7, 7 }
 0x48a   :  { %v2970_v28 = vmul.f32 %v972_v10, %v820_v47  ;;  %v963_v13 = vsub.f32 1.0, %v959_v5  ;;  %v1901_v5 = vld [vmem:[%s3770_s1 + $0x28] ss:$0 sm:$0xff] }
 0x48b   :  { %1026 = vrot.lane.b32.xlu2 %v2968_v51, %s1998_s20  ;;  %v966_v39 = vmul.f32 %v962_v50, %v830_v42 }
 0x48c   :  { %1048 = vrot.lane.b32.xlu1 %v2970_v28, %s1997_s17  ;;  %1096 = vrot.lane.b32.xlu0 %v2970_v28, %s1995_s30  ;;  %v967_v16 = vmul.f32 %v963_v13, %v831_v59  ;;  %v1902_v13 = vld [vmem:[%s3770_s1 + $0x30] ss:$0 sm:$0xff] }
 0x48d   :  { %v970_v48 = vadd.f32 1.0, %v966_v39 }
 0x48e   :  { %v971_v21 = vadd.f32 1.0, %v967_v16 }
 0x48f   :  { %v2996_v60 = vmul.f32 %v970_v48, %v818_v58 }
 0x490   :  { %v3005_v24 = vmul.f32 %v971_v21, %v819_v45  ;;  %v3819_v21 = vperm.slane %v2174_v12, 7 }
 0x493   :  { %994 = vrot.lane.b32.xlu2 %v2968_v51, %s2000_s0 }
 0x494   :  { %1080 = vrot.lane.b32.xlu0 %v2970_v28, %s1994_s29  ;;  %1010 = vrot.lane.b32.xlu1 %v2968_v51, %s1999_s21 }
 0x49b   :  { %1074 = vrot.lane.b32.xlu2 %v2968_v51, %s1994_s29 }
 0x49c   :  { %1064 = vrot.lane.b32.xlu0 %v2970_v28, %s1996_s16  ;;  %1090 = vrot.lane.b32.xlu1 %v2968_v51, %s1995_s30 }
 0x4a3   :  { %1092 = vrot.lane.b32.xlu2 %v2996_v60, %s1995_s30 }
 0x4a4   :  { %978 = vrot.lane.b32.xlu0 %v2968_v51, %s2001_s22  ;;  %1076 = vrot.lane.b32.xlu1 %v2996_v60, %s1994_s29 }
 0x4ab   :  { %1078 = vrot.lane.b32.xlu2 %v3005_v24, %s1994_s29 }
 0x4ac   :  { %1058 = vrot.lane.b32.xlu0 %v2968_v51, %s1996_s16  ;;  %1060 = vrot.lane.b32.xlu1 %v2996_v60, %s1996_s16 }
 0x4b3   :  { %1062 = vrot.lane.b32.xlu2 %v3005_v24, %s1996_s16 }
 0x4b4   :  { %1094 = vrot.lane.b32.xlu0 %v3005_v24, %s1995_s30  ;;  %1044 = vrot.lane.b32.xlu1 %v2996_v60, %s1997_s17 }
 0x4bb   :  { %1046 = vrot.lane.b32.xlu2 %v3005_v24, %s1997_s17 }
 0x4bc   :  { %1028 = vrot.lane.b32.xlu0 %v2996_v60, %s1998_s20  ;;  %1014 = vrot.lane.b32.xlu1 %v3005_v24, %s1999_s21 }
 0x4c3   :  { %1012 = vrot.lane.b32.xlu2 %v2996_v60, %s1999_s21 }
 0x4c4   :  { %1030 = vrot.lane.b32.xlu0 %v3005_v24, %s1998_s20  ;;  %980 = vrot.lane.b32.xlu1 %v2996_v60, %s2001_s22 }
 0x4cb   :  { %998 = vrot.lane.b32.xlu2 %v3005_v24, %s2000_s0 }
 0x4cc   :  { %996 = vrot.lane.b32.xlu0 %v2996_v60, %s2000_s0  ;;  %982 = vrot.lane.b32.xlu1 %v3005_v24, %s2001_s22 }
 0x4d3   :  { %1042 = vrot.lane.b32.xlu2 %v2968_v51, %s1997_s17 }
 0x4d4   :  { %1032 = vrot.lane.b32.xlu0 %v2970_v28, %s1998_s20  ;;  %1016 = vrot.lane.b32.xlu1 %v2970_v28, %s1999_s21 }
 0x4db   :  { %1000 = vrot.lane.b32.xlu2 %v2970_v28, %s2000_s0 }
 0x4dc   :  { %984 = vrot.lane.b32.xlu0 %v2970_v28, %s2001_s22  ;;  %1109 = vperm.xlu1 %1857, %v1106_v2   ;;  %v3820_v2 = vperm.slane %v2282_v9, 7 }
 0x4e4   :  { %1407 = vperm.xlu1 %1857, %v1195_v6  }
 0x4e5   :  { %v3053_v55 = vpop.permute.xlu2 %1026 }
 0x4ed   :  { %v3055_v3 = vpop.permute.xlu2 %994 }
 0x4f5   :  { %v1075_v56 = vpop.permute.xlu2 %1074 }
 0x4fd   :  { %v1093_v38 = vpop.permute.xlu2 %1092 }
 0x4fe   :  { %v3057_v18 = vpop.permute.xlu1 %1048  ;;  %v1097_v54 = vpop.permute.xlu0 %1096 }
 0x505   :  { %v1079_v40 = vpop.permute.xlu2 %1078 }
 0x506   :  { %v1081_v19 = vpop.permute.xlu0 %1080  ;;  %v3059_v32 = vpop.permute.xlu1 %1010 }
 0x507   :  { %v1085_v14 = vsel %vm260_vm0, %v1081_v19, %v1075_v56  ;;  %v1082_v1 = vsel %vm260_vm0, %v1079_v40, %v1081_v19  ;;  %v3822_v19 = vperm.slane %v2282_v9, 6 }
 0x508   :  { %v1089_v49 = vmul.f32 %v1085_v14, %v3815_v62  ;;  %v1088_v45 = vmul.f32 %v1082_v1, %v3819_v21 }
 0x50d   :  { %v1063_v41 = vpop.permute.xlu2 %1062 }
 0x50e   :  { %v1065_v53 = vpop.permute.xlu0 %1064  ;;  %v1091_v61 = vpop.permute.xlu1 %1090 }
 0x50f   :  { %v1100_v15 = vsel %vm281_vm1, %v1091_v61, %v1093_v38  ;;  %v1101_v26 = vsel %vm281_vm1, %v1097_v54, %v1091_v61  ;;  %v1066_v59 = vsel %vm239_vm2, %v1063_v41, %v1065_v53 }
 0x510   :  { %v1102_v63 = vmul.f32 %v1899_v44, %v1100_v15  ;;  %v1105_v20 = vmul.f32 %v1900_v0, %v1101_v26  ;;  %v3824_v15 = vperm.slane %v2282_v9, 5 }
 0x512   :  { %1122 = vmatpush.msrb.mxu1 %v1102_v63  ;;  %1182 = vmatpush.msra.mxu0 %v1105_v20 }
 0x514   :  { %1183 = vmatpush.msra.mxu0 %v1089_v49  ;;  %v3825_v49 = vperm.slane %v2277_v7, 5 }
 0x515   :  { %v1047_v22 = vpop.permute.xlu2 %1046 }
 0x516   :  { %v3075_v23 = vpop.permute.xlu0 %978  ;;  %v1077_v35 = vpop.permute.xlu1 %1076 }
 0x517   :  { %v1084_v43 = vsel %vm260_vm0, %v1075_v56, %v1077_v35  ;;  %v1083_v37 = vsel %vm260_vm0, %v1077_v35, %v1079_v40  ;;  %v1050_v56 = vsel %vm218_vm3, %v1047_v22, %v3057_v18  ;;  %v3826_v35 = vperm.slane %v2205_v30, 5 }
 0x518   :  { %v1086_v46 = vmul.f32 %v1084_v43, %v3816_v36  ;;  %v1087_v6 = vmul.f32 %v1083_v37, %v3820_v2  ;;  %v3831_v37 = vperm.slane %v2282_v9, 1  ;;  %vm3835_vm0 = vcmask 588800  }
 0x51a   :  { %1123 = vmatpush.msrb.mxu1 %v1086_v46 }
 0x51d   :  { %v1013_v47 = vpop.permute.xlu2 %1012 }
 0x51e   :  { %v1059_v10 = vpop.permute.xlu0 %1058  ;;  %v1061_v57 = vpop.permute.xlu1 %1060  ;;  %v1020_v36 = vsel %vm176_vm5, %v3059_v32, %v1013_v47 }
 0x51f   :  { %v1069_v17 = vsel %vm239_vm2, %v1065_v53, %v1059_v10  ;;  %v1068_v29 = vsel %vm239_vm2, %v1059_v10, %v1061_v57  ;;  %v1067_v16 = vsel %vm239_vm2, %v1061_v57, %v1063_v41  ;;  %v3823_v53 = vperm.slane %v2174_v12, 5  ;;  %vm3845_vm2 = vmmov %vm3835_vm0 }
 0x520   :  { %v1073_v27 = vmul.f32 %v1069_v17, %v3817_v25  ;;  %v1070_v52 = vmul.f32 %v1068_v29, %v3818_v34  ;;  %v1071_v41 = vmul.f32 %v1067_v16, %v3822_v19  ;;  %v3828_v10 = vperm.slane %v2282_v9, 2  ;;  %v977_v16 = vld [vmem:[%s3778_s9] sm:$0xff] }
 0x521   :  { %v1056_v61 = vmul.f32 %v1050_v56, %v3823_v53 }
 0x522   :  { %1124 = vmatpush.msrb.mxu1 %v1070_v52  ;;  %1184 = vmatpush.msra.mxu0 %v1073_v27  ;;  %v1023_v57 = vmul.f32 %v1020_v36, %v3828_v10  ;;  %v3271_v10 = vld [vmem:[%s3771_s2 + $0x158] sm:$0xff] }
 0x525   :  { %v3089_v4 = vpop.permute.xlu2 %998 }
 0x526   :  { %v1095_v31 = vpop.permute.xlu0 %1094  ;;  %v1045_v50 = vpop.permute.xlu1 %1044 }
 0x527   :  { %v1098_v42 = vsel %vm281_vm1, %v1095_v31, %v1097_v54  ;;  %v1099_v39 = vsel %vm281_vm1, %v1093_v38, %v1095_v31  ;;  %v1051_v38 = vsel %vm218_vm3, %v1045_v50, %v1047_v22  ;;  %v3821_v54 = vperm.slane %v2174_v12, 6  ;;  %vm3836_vm1 = vmmov %vm3835_vm0 }
 0x528   :  { %v1103_v48 = vmul.f32 %v1901_v5, %v1099_v39  ;;  %v1104_v58 = vmul.f32 %v1902_v13, %v1098_v42  ;;  %v1055_v26 = vmul.f32 %v1051_v38, %v3824_v15  ;;  %v3832_v39 = vperm.slane %v2174_v12, 1 }
 0x529   :  { %v1072_v40 = vmul.f32 %v1066_v59, %v3821_v54  ;;  %v3839_v15 = vperm.slane %v2277_v7, 2 }
 0x52a   :  { %1142 = vmatpush.msrb.mxu2 %v1103_v48  ;;  %1162 = vmatpush.msrb.mxu3 %v1104_v58  ;;  %v3833_v48 = vperm.slane %v2282_v9, 0  ;;  %v3834_v58 = vperm.slane %v2174_v12, 0 }
 0x52c   :  { %1143 = vmatpush.msrb.mxu2 %v1087_v6  ;;  %1163 = vmatpush.msrb.mxu3 %v1088_v45 }
 0x52d   :  { %v1043_v14 = vpop.permute.xlu2 %1042 }
 0x52e   :  { %v1029_v44 = vpop.permute.xlu0 %1028  ;;  %v1015_v63 = vpop.permute.xlu1 %1014  ;;  %1144 = vmatpush.msrb.mxu2 %v1071_v41  ;;  %1164 = vmatpush.msrb.mxu3 %v1072_v40  ;;  %v1052_v0 = vsel %vm218_vm3, %v1043_v14, %v1045_v50  ;;  %v1053_v20 = vsel %vm218_vm3, %v3057_v18, %v1043_v14  ;;  %v3827_v18 = vperm.slane %v2282_v9, 3  ;;  %v3190_v9 = vld [vmem:[%s3771_s2 + $0x178] sm:$0xff]  ;;  %v3837_v40 = vperm.slane %v2277_v7, 3  ;;  %v3222_v14 = vld [vmem:[%s3771_s2 + $0x170] sm:$0xff]  ;;  %vm3846_vm3 = vmmov %vm3835_vm0 }
 0x52f   :  { %v1036_v62 = vsel %vm197_vm4, %v3053_v55, %v1029_v44  ;;  %v1054_v22 = vmul.f32 %v1052_v0, %v3825_v49  ;;  %v1057_v43 = vmul.f32 %v1053_v20, %v3826_v35  ;;  %v1019_v25 = vsel %vm176_vm5, %v1013_v47, %v1015_v63  ;;  %v3254_v35 = vld [vmem:[%s3771_s2 + $0x160] sm:$0xff] }
 0x530   :  { %1145 = vmatpush.msrb.mxu2 %v1055_v26  ;;  %1165 = vmatpush.msrb.mxu3 %v1056_v61  ;;  %v1039_v46 = vmul.f32 %v1036_v62, %v3827_v18  ;;  %v3838_v41 = vperm.slane %v2205_v30, 3  ;;  %v3210_v61 = vld [vmem:[%s3771_s2 + $0xf0] sm:$0xff]  ;;  %v3841_v0 = vperm.slane %v2277_v7, 1  ;;  %v3842_v62 = vperm.slane %v2205_v30, 1 }
 0x531   :  { %1125 = vmatpush.msrb.mxu1 %v1054_v22  ;;  %1185 = vmatpush.msra.mxu0 %v1057_v43  ;;  %v3248_v22 = vld [vmem:[%s3771_s2 + $0xe0] sm:$0xff] }
 0x532   :  { %1146 = vmatpush.msrb.mxu2 %v2996_v60  ;;  %1166 = vmatpush.msrb.mxu3 %v3005_v24  ;;  %v3829_v60 = vperm.slane %v2174_v12, 3 }
 0x533   :  { %1126 = vmatpush.msrb.mxu1 %v2968_v51  ;;  %1186 = vmatpush.msra.mxu0 %v2970_v28  ;;  %v3830_v51 = vperm.slane %v2174_v12, 2  ;;  %v3184_v12 = vld [vmem:[%s3771_s2 + $0xf8] sm:$0xff] }
 0x534   :  { %1147 = vmatpush.msrb.mxu2 %v1039_v46  ;;  %v3265_v46 = vld [vmem:[%s3771_s2 + $0xd8] sm:$0xff] }
 0x535   :  { %v1024_v34 = vmul.f32 %v1019_v25, %v3830_v51  ;;  %v1001_v21 = vpop.permute.xlu2 %1000  ;;  %v3287_v25 = vld [vmem:[%s3771_s2 + $0x150] sm:$0xff] }
 0x536   :  { %v1031_v17 = vpop.permute.xlu0 %1030  ;;  %v981_v29 = vpop.permute.xlu1 %980  ;;  %1148 = vmatpush.msrb.mxu2 %v1023_v57  ;;  %v3843_v57 = vperm.slane %v2277_v7, 0  ;;  %v3301_v7 = vld [vmem:[%s3771_s2 + $0x1f8] sm:$0xff]  ;;  %v3325_v51 = vld [vmem:[%s3771_s2 + $0x1f0] sm:$0xff] }
 0x537   :  { %v1035_v27 = vsel %vm197_vm4, %v1029_v44, %v1031_v17  ;;  %v988_v31 = vsel %vm134_vm7, %v3075_v23, %v981_v29  ;;  %v3840_v44 = vperm.slane %v2205_v30, 2  ;;  %v3295_v30 = vld [vmem:[%s3771_s2 + $0x78] sm:$0xff] }
 0x538   :  { %v1040_v24 = vmul.f32 %v1035_v27, %v3829_v60  ;;  %v991_v13 = vmul.f32 %v988_v31, %v3833_v48  ;;  %v3307_v27 = vld [vmem:[%s3771_s2 + $0xc8] sm:$0xff]  ;;  %v3397_v48 = vld [vmem:[%s3771_s2 + $0x1d8] sm:$0xff] }
 0x539   :  { %v3313_v60 = vld [vmem:[%s3771_s2 + $0x148] sm:$0xff] }
 0x53a   :  { %1167 = vmatpush.msrb.mxu3 %v1040_v24  ;;  %v3319_v24 = vld [vmem:[%s3771_s2 + $0x70] sm:$0xff]  ;;  %v3349_v31 = vld [vmem:[%s3771_s2 + $0x1e8] sm:$0xff] }
 0x53c   :  { %1168 = vmatpush.msrb.mxu3 %v1024_v34  ;;  %v3331_v34 = vld [vmem:[%s3771_s2 + $0xc0] sm:$0xff] }
 0x53e   :  { %v997_v28 = vpop.permute.xlu0 %996  ;;  %v983_v52 = vpop.permute.xlu1 %982 }
 0x53f   :  { %v1003_v47 = vsel %vm155_vm6, %v997_v28, %v3089_v4  ;;  %v1004_v50 = vsel %vm155_vm6, %v3055_v3, %v997_v28  ;;  %v987_v1 = vsel %vm134_vm7, %v981_v29, %v983_v52  ;;  %v3281_v29 = vld [vmem:[%s3771_s2 + $0xd0] sm:$0xff]  ;;  %v3337_v28 = vld [vmem:[%s3771_s2 + $0x140] sm:$0xff] }
 0x540   :  { %v1007_v42 = vmul.f32 %v1004_v50, %v3831_v37  ;;  %v1008_v5 = vmul.f32 %v1003_v47, %v3832_v39  ;;  %v992_v59 = vmul.f32 %v987_v1, %v3834_v58  ;;  %v3355_v47 = vld [vmem:[%s3771_s2 + $0xb8] sm:$0xff]  ;;  %v3367_v1 = vld [vmem:[%s3771_s2 + $0x60] sm:$0xff]  ;;  %v3385_v39 = vld [vmem:[%s3771_s2 + $0x130] sm:$0xff] }
 0x541   :  { %v3361_v50 = vld [vmem:[%s3771_s2 + $0x138] sm:$0xff]  ;;  %v3373_v37 = vld [vmem:[%s3771_s2 + $0x1e0] sm:$0xff]  ;;  %v3409_v58 = vld [vmem:[%s3771_s2 + $0x128] sm:$0xff] }
 0x542   :  { %1149 = vmatpush.msrb.mxu2 %v1007_v42  ;;  %1169 = vmatpush.msrb.mxu3 %v1008_v5  ;;  %v3379_v42 = vld [vmem:[%s3771_s2 + $0xb0] sm:$0xff]  ;;  %v3391_v5 = vld [vmem:[%s3771_s2 + $0x58] sm:$0xff] }
 0x544   :  { %1150 = vmatpush.msrb.mxu2 %v991_v13  ;;  %1170 = vmatpush.msrb.mxu3 %v992_v59  ;;  %v3403_v13 = vld [vmem:[%s3771_s2 + $0xa8] sm:$0xff]  ;;  %v3415_v59 = vld [vmem:[%s3771_s2 + $0x50] sm:$0xff] }
 0x545   :  { %1823 = vmatmul.msk.f32.vlgmr.msrb.gmra.mxu2 %vm3835_vm0, %v977_v16  ;;  %1824 = vmatmul.msk.f32.vlgmr.msrb.gmra.mxu3 %vm3836_vm1, %v977_v16 }
 0x546   :  { %v1033_v45 = vpop.permute.xlu0 %1032  ;;  %v1017_v2 = vpop.permute.xlu1 %1016  ;;  %1217 = vmatpush.msra.mxu2 %v3184_v12  ;;  %1237 = vmatpush.msra.mxu3 %v3190_v9 }
 0x547   :  { %v1034_v6 = vsel %vm197_vm4, %v1031_v17, %v1033_v45  ;;  %v1037_v56 = vsel %vm197_vm4, %v1033_v45, %v3053_v55  ;;  %v1018_v38 = vsel %vm176_vm5, %v1015_v63, %v1017_v2  ;;  %v1021_v54 = vsel %vm176_vm5, %v1017_v2, %v3059_v32  ;;  %v3433_v45 = vld [vmem:[%s3771_s2 + $0x120] sm:$0xff]  ;;  %v3439_v2 = vld [vmem:[%s3771_s2 + $0x48] sm:$0xff] }
 0x548   :  { %v1038_v19 = vmul.f32 %v1037_v56, %v3837_v40  ;;  %v1041_v53 = vmul.f32 %v1034_v6, %v3838_v41  ;;  %1218 = vmatpush.msra.mxu2 %v3210_v61  ;;  %v1002_v55 = vsel %vm155_vm6, %v3089_v4, %v1001_v21  ;;  %v1005_v32 = vsel %vm155_vm6, %v1001_v21, %v3055_v3  ;;  %v3232_v4 = vld [vmem:[%s3771_s2 + $0xe8] sm:$0xff]  ;;  %v3427_v21 = vld [vmem:[%s3771_s2 + $0xa0] sm:$0xff]  ;;  %v3451_v56 = vld [vmem:[%s3771_s2 + $0x98] sm:$0xff] }
 0x549   :  { %1238 = vmatpush.msra.mxu3 %v3222_v14  ;;  %v1022_v26 = vmul.f32 %v1021_v54, %v3839_v15  ;;  %v1025_v63 = vmul.f32 %v1018_v38, %v3840_v44  ;;  %v3238_v3 = vld [vmem:[%s3771_s2 + $0x168] sm:$0xff]  ;;  %v1006_v20 = vmul.f32 %v1005_v32, %v3841_v0  ;;  %v1009_v49 = vmul.f32 %v1002_v55, %v3842_v62  ;;  %v3457_v38 = vld [vmem:[%s3771_s2 + $0x118] sm:$0xff]  ;;  %v3463_v54 = vld [vmem:[%s3771_s2 + $0x40] sm:$0xff] }
 0x54a   :  { %1127 = vmatpush.msrb.mxu1 %v1038_v19  ;;  %1187 = vmatpush.msra.mxu0 %v1041_v53  ;;  %v3445_v6 = vld [vmem:[%s3771_s2 + $0x1c8] sm:$0xff]  ;;  %v3469_v40 = vld [vmem:[%s3771_s2 + $0x1c0] sm:$0xff]  ;;  %v3475_v19 = vld [vmem:[%s3771_s2 + $0x90] sm:$0xff]  ;;  %vm3847_vm4 = vcmask 15360   ;;  %vm3848_vm5 = vcmask 64512   ;;  %vm3849_vm6 = vcmask 1041408  }
 0x54b   :  { %1219 = vmatpush.msra.mxu2 %v3232_v4  ;;  %1239 = vmatpush.msra.mxu3 %v3238_v3  ;;  %v3481_v41 = vld [vmem:[%s3771_s2 + $0x110] sm:$0xff]  ;;  %v3487_v53 = vld [vmem:[%s3771_s2 + $0x38] sm:$0xff]  ;;  %v3499_v32 = vld [vmem:[%s3771_s2 + $0x88] sm:$0xff] }
 0x54c   :  { %1128 = vmatpush.msrb.mxu1 %v1022_v26  ;;  %1188 = vmatpush.msra.mxu0 %v1025_v63  ;;  %v3493_v55 = vld [vmem:[%s3771_s2 + $0x1b8] sm:$0xff]  ;;  %v3505_v15 = vld [vmem:[%s3771_s2 + $0x108] sm:$0xff]  ;;  %v3511_v26 = vld [vmem:[%s3771_s2 + $0x30] sm:$0xff] }
 0x54d   :  { %1220 = vmatpush.msra.mxu2 %v3248_v22  ;;  %1240 = vmatpush.msra.mxu3 %v3254_v35  ;;  %v3517_v44 = vld [vmem:[%s3771_s2 + $0x1b0] sm:$0xff]  ;;  %v3523_v63 = vld [vmem:[%s3771_s2 + $0x80] sm:$0xff]  ;;  %v3541_v62 = vld [vmem:[%s3771_s2 + $0x1a8] sm:$0xff] }
 0x54e   :  { %v985_v43 = vpop.permute.xlu0 %984  ;;  %1129 = vmatpush.msrb.mxu1 %v1006_v20  ;;  %1189 = vmatpush.msra.mxu0 %v1009_v49  ;;  %v3529_v0 = vld [vmem:[%s3771_s2 + $0x100] sm:$0xff]  ;;  %v3535_v20 = vld [vmem:[%s3771_s2 + $0x28] sm:$0xff]  ;;  %vm3851_vm11 = vmmov %vm3849_vm6 }
 0x54f   :  { %v986_v36 = vsel %vm134_vm7, %v983_v52, %v985_v43  ;;  %v989_v18 = vsel %vm134_vm7, %v985_v43, %v3075_v23  ;;  %1221 = vmatpush.msra.mxu2 %v3265_v46  ;;  %1241 = vmatpush.msra.mxu3 %v3271_v10  ;;  %v3343_v52 = vld [vmem:[%s3771_s2 + $0x68] sm:$0xff]  ;;  %v3549_v49 = vld [vmem:[%s3771_s2 + $0x20] sm:$0xff]  ;;  %vm3850_vm7 = vmmov %vm3849_vm6 }
 0x550   :  { %v990_v17 = vmul.f32 %v989_v18, %v3843_v57  ;;  %v993_v23 = vmul.f32 %v986_v36, %v3844_v11  ;;  %v3555_v43 = vld [vmem:[%s3771_s2 + $0x1a0] sm:$0xff]  ;;  %v1110_v36 = vpop.permute.xlu1 %1109  ;;  %vm3852_vm12 = vmmov %vm3849_vm6 }
 0x551   :  { %1222 = vmatpush.msra.mxu2 %v3281_v29  ;;  %1242 = vmatpush.msra.mxu3 %v3287_v25  ;;  %vm3853_vm9 = vmmov %vm3849_vm6 }
 0x552   :  { %1130 = vmatpush.msrb.mxu1 %v990_v17  ;;  %1190 = vmatpush.msra.mxu0 %v993_v23  ;;  %vm3854_vm8 = vmmov %vm3849_vm6 }
 0x553   :  { %1822 = vmatmul.msk.f32.vlgmr.msrb.gmra.mxu1 %vm3845_vm2, %v977_v16  ;;  %1825 = vmatmul.msk.f32.vlgmr.msra.gmra.mxu0 %vm3846_vm3, %v977_v16  ;;  %v3421_v16 = vld [vmem:[%s3771_s2 + $0x1d0] sm:$0xff]  ;;  %vm3855_vm10 = vmmov %vm3849_vm6 }
 0x554   :  { %1197 = vmatpush.msra.mxu1 %v3295_v30  ;;  %1257 = vmatpush.msrb.mxu0 %v3301_v7  ;;  %vm3856_vm0 = vmmov %vm3849_vm6 }
 0x555   :  { %1223 = vmatpush.msra.mxu2 %v3307_v27  ;;  %1243 = vmatpush.msra.mxu3 %v3313_v60  ;;  %vm3857_vm1 = vmmov %vm3847_vm4 }
 0x556   :  { %1198 = vmatpush.msra.mxu1 %v3319_v24  ;;  %1258 = vmatpush.msrb.mxu0 %v3325_v51  ;;  %vm3858_vm2 = vmmov %vm3857_vm1 }
 0x557   :  { %1224 = vmatpush.msra.mxu2 %v3331_v34  ;;  %1244 = vmatpush.msra.mxu3 %v3337_v28  ;;  %vm3859_vm3 = vmmov %vm3857_vm1 }
 0x558   :  { %1199 = vmatpush.msra.mxu1 %v3343_v52  ;;  %1259 = vmatpush.msrb.mxu0 %v3349_v31 }
 0x559   :  { %1225 = vmatpush.msra.mxu2 %v3355_v47  ;;  %1245 = vmatpush.msra.mxu3 %v3361_v50 }
 0x55a   :  { %1200 = vmatpush.msra.mxu1 %v3367_v1  ;;  %1260 = vmatpush.msrb.mxu0 %v3373_v37 }
 0x55b   :  { %1226 = vmatpush.msra.mxu2 %v3379_v42  ;;  %1246 = vmatpush.msra.mxu3 %v3385_v39 }
 0x55c   :  { %1201 = vmatpush.msra.mxu1 %v3391_v5  ;;  %1261 = vmatpush.msrb.mxu0 %v3397_v48 }
 0x55d   :  { %1227 = vmatpush.msra.mxu2 %v3403_v13  ;;  %1247 = vmatpush.msra.mxu3 %v3409_v58 }
 0x55e   :  { %1202 = vmatpush.msra.mxu1 %v3415_v59  ;;  %1262 = vmatpush.msrb.mxu0 %v3421_v16 }
 0x55f   :  { %1228 = vmatpush.msra.mxu2 %v3427_v21  ;;  %1248 = vmatpush.msra.mxu3 %v3433_v45 }
 0x560   :  { %1203 = vmatpush.msra.mxu1 %v3439_v2  ;;  %1263 = vmatpush.msrb.mxu0 %v3445_v6 }
 0x561   :  { %1229 = vmatpush.msra.mxu2 %v3451_v56  ;;  %1249 = vmatpush.msra.mxu3 %v3457_v38 }
 0x562   :  { %1204 = vmatpush.msra.mxu1 %v3463_v54  ;;  %1264 = vmatpush.msrb.mxu0 %v3469_v40 }
 0x563   :  { %1230 = vmatpush.msra.mxu2 %v3475_v19  ;;  %1250 = vmatpush.msra.mxu3 %v3481_v41 }
 0x564   :  { %1205 = vmatpush.msra.mxu1 %v3487_v53  ;;  %1265 = vmatpush.msrb.mxu0 %v3493_v55 }
 0x565   :  { %1231 = vmatpush.msra.mxu2 %v3499_v32  ;;  %1251 = vmatpush.msra.mxu3 %v3505_v15 }
 0x566   :  { %1206 = vmatpush.msra.mxu1 %v3511_v26  ;;  %1266 = vmatpush.msrb.mxu0 %v3517_v44 }
 0x567   :  { %1232 = vmatpush.msra.mxu2 %v3523_v63  ;;  %1252 = vmatpush.msra.mxu3 %v3529_v0 }
 0x568   :  { %1207 = vmatpush.msra.mxu1 %v3535_v20  ;;  %1267 = vmatpush.msrb.mxu0 %v3541_v62 }
 0x569   :  { %1301 = vmatpush.msrb.mxu2 %v3184_v12  ;;  %1321 = vmatpush.msrb.mxu3 %v3190_v9  ;;  %v3563_v12 = vld [vmem:[%s3771_s2 + $0x18] sm:$0xff] }
 0x56a   :  { %1208 = vmatpush.msra.mxu1 %v3549_v49  ;;  %1268 = vmatpush.msrb.mxu0 %v3555_v43  ;;  %v3569_v9 = vld [vmem:[%s3771_s2 + $0x198] sm:$0xff] }
 0x56b   :  { %1302 = vmatpush.msrb.mxu2 %v3210_v61  ;;  %1322 = vmatpush.msrb.mxu3 %v3222_v14  ;;  %v3577_v61 = vld [vmem:[%s3771_s2 + $0x10] sm:$0xff] }
 0x56c   :  { %1209 = vmatpush.msra.mxu1 %v3563_v12  ;;  %1269 = vmatpush.msrb.mxu0 %v3569_v9  ;;  %v1962_v14 = vld [vmem:[%s3771_s2 + $0x190] sm:$0xff] }
 0x56d   :  { %1303 = vmatpush.msrb.mxu2 %v3232_v4  ;;  %1323 = vmatpush.msrb.mxu3 %v3238_v3  ;;  %v1963_v4 = vld [vmem:[%s3771_s2 + $0x8] sm:$0xff] }
 0x56e   :  { %1210 = vmatpush.msra.mxu1 %v3577_v61  ;;  %1270 = vmatpush.msrb.mxu0 %v1962_v14  ;;  %v1964_v3 = vld [vmem:[%s3771_s2 + $0x188] sm:$0xff] }
 0x56f   :  { %1304 = vmatpush.msrb.mxu2 %v3248_v22  ;;  %1324 = vmatpush.msrb.mxu3 %v3254_v35  ;;  %v1965_v22 = vld [vmem:[%s3771_s2] sm:$0xff] }
 0x570   :  { %1211 = vmatpush.msra.mxu1 %v1963_v4  ;;  %1271 = vmatpush.msrb.mxu0 %v1964_v3  ;;  %v1966_v35 = vld [vmem:[%s3771_s2 + $0x180] sm:$0xff] }
 0x571   :  { %1305 = vmatpush.msrb.mxu2 %v3265_v46  ;;  %1325 = vmatpush.msrb.mxu3 %v3271_v10 }
 0x572   :  { %1212 = vmatpush.msra.mxu1 %v1965_v22  ;;  %1272 = vmatpush.msrb.mxu0 %v1966_v35 }
 0x573   :  { %1306 = vmatpush.msrb.mxu2 %v3281_v29  ;;  %1326 = vmatpush.msrb.mxu3 %v3287_v25 }
 0x574   :  { %1281 = vmatpush.msrb.mxu1 %v3295_v30  ;;  %1341 = vmatpush.msra.mxu0 %v3301_v7 }
 0x575   :  { %1307 = vmatpush.msrb.mxu2 %v3307_v27  ;;  %1327 = vmatpush.msrb.mxu3 %v3313_v60 }
 0x576   :  { %1282 = vmatpush.msrb.mxu1 %v3319_v24  ;;  %1342 = vmatpush.msra.mxu0 %v3325_v51 }
 0x577   :  { %1308 = vmatpush.msrb.mxu2 %v3331_v34  ;;  %1328 = vmatpush.msrb.mxu3 %v3337_v28 }
 0x578   :  { %1283 = vmatpush.msrb.mxu1 %v3343_v52  ;;  %1343 = vmatpush.msra.mxu0 %v3349_v31 }
 0x579   :  { %1309 = vmatpush.msrb.mxu2 %v3355_v47  ;;  %1329 = vmatpush.msrb.mxu3 %v3361_v50 }
 0x57a   :  { %1284 = vmatpush.msrb.mxu1 %v3367_v1  ;;  %1344 = vmatpush.msra.mxu0 %v3373_v37 }
 0x57b   :  { %1310 = vmatpush.msrb.mxu2 %v3379_v42  ;;  %1330 = vmatpush.msrb.mxu3 %v3385_v39 }
 0x57c   :  { %1285 = vmatpush.msrb.mxu1 %v3391_v5  ;;  %1345 = vmatpush.msra.mxu0 %v3397_v48 }
 0x57d   :  { %1311 = vmatpush.msrb.mxu2 %v3403_v13  ;;  %1331 = vmatpush.msrb.mxu3 %v3409_v58  ;;  %v1967_v58 = vld [vmem:[%s3773_s4] sm:$0xff]  ;;  %s2006_s4 = smov [#allocation2]  }
 0x57e   :  { %1286 = vmatpush.msrb.mxu1 %v3415_v59  ;;  %1346 = vmatpush.msra.mxu0 %v3421_v16 }
 0x57f   :  { %1312 = vmatpush.msrb.mxu2 %v3427_v21  ;;  %1332 = vmatpush.msrb.mxu3 %v3433_v45  ;;  %v1196_v45 = vld [vmem:[%s3781_s12] sm:$0xff]  ;;  %s1790_s12 = sshll.u32 %s2006_s4, 4  ;;  %s1791_s12 = int_to_ptr.vmem [resolvable:$true] %s1790_s12 }
 0x580   :  { %1287 = vmatpush.msrb.mxu1 %v3439_v2  ;;  %1347 = vmatpush.msra.mxu0 %v3445_v6  ;;  %v1423_v2 = vld.sshfl [vmem:[#allocation1] sm:$0xff pattern:$0x73625140]  ;;  %v1424_v6 = vld.sshfl [vmem:[#allocation1 + $0x8] sm:$0xff pattern:$0x73625140] }
 0x581   :  { %1313 = vmatpush.msrb.mxu2 %v3451_v56  ;;  %1333 = vmatpush.msrb.mxu3 %v3457_v38  ;;  %v1425_v56 = vld.sshfl [vmem:[#allocation1 + $0x10] sm:$0xff pattern:$0x73625140]  ;;  %v1426_v38 = vld.sshfl [vmem:[#allocation1 + $0x18] sm:$0xff pattern:$0x73625140] }
 0x582   :  { %1288 = vmatpush.msrb.mxu1 %v3463_v54  ;;  %1348 = vmatpush.msra.mxu0 %v3469_v40  ;;  %1517 = vst [vmem:[#allocation1] ss:$4 sm:$0xff] %v2891_v8 }
 0x583   :  { %1314 = vmatpush.msrb.mxu2 %v3475_v19  ;;  %1334 = vmatpush.msrb.mxu3 %v3481_v41 }
 0x584   :  { %1289 = vmatpush.msrb.mxu1 %v3487_v53  ;;  %1349 = vmatpush.msra.mxu0 %v3493_v55 }
 0x585   :  { %1315 = vmatpush.msrb.mxu2 %v3499_v32  ;;  %1335 = vmatpush.msrb.mxu3 %v3505_v15 }
 0x586   :  { %1290 = vmatpush.msrb.mxu1 %v3511_v26  ;;  %1350 = vmatpush.msra.mxu0 %v3517_v44 }
 0x587   :  { %1316 = vmatpush.msrb.mxu2 %v3523_v63  ;;  %1336 = vmatpush.msrb.mxu3 %v3529_v0  ;;  %v1408_v63 = vpop.permute.xlu1 %1407 }
 0x588   :  { %1291 = vmatpush.msrb.mxu1 %v3535_v20  ;;  %1351 = vmatpush.msra.mxu0 %v3541_v62 }
 0x589   :  { %v1518_v8 = vld.sshfl [vmem:[#allocation1] sm:$0xff pattern:$0x73625140]  ;;  %v1519_v62 = vld.sshfl [vmem:[#allocation1 + $0x8] sm:$0xff pattern:$0x73625140] }
 0x58a   :  { %1292 = vmatpush.msrb.mxu1 %v3549_v49  ;;  %1352 = vmatpush.msra.mxu0 %v3555_v43  ;;  %v1520_v49 = vld.sshfl [vmem:[#allocation1 + $0x10] sm:$0xff pattern:$0x73625140]  ;;  %v1521_v43 = vld.sshfl [vmem:[#allocation1 + $0x18] sm:$0xff pattern:$0x73625140] }
 0x58c   :  { %1293 = vmatpush.msrb.mxu1 %v3563_v12  ;;  %1353 = vmatpush.msra.mxu0 %v3569_v9 }
 0x58e   :  { %1294 = vmatpush.msrb.mxu1 %v3577_v61  ;;  %1354 = vmatpush.msra.mxu0 %v1962_v14 }
 0x590   :  { %1295 = vmatpush.msrb.mxu1 %v1963_v4  ;;  %1355 = vmatpush.msra.mxu0 %v1964_v3 }
 0x592   :  { %1296 = vmatpush.msrb.mxu1 %v1965_v22  ;;  %1356 = vmatpush.msra.mxu0 %v1966_v35 }
 0x5c8   :  { %v1152_v18 = vpop.f32.mrf.mxu2  ;;  %v1172_v46 = vpop.f32.mrf.mxu3 }
 0x5c9   :  { %v3648_v10 = vadd.f32 %v1152_v18, %v1110_v36  ;;  %v3650_v57 = vadd.f32 %v1172_v46, %v1110_v36 }
 0x5cb   :  { %1233 = vmatmul.f32.vlgmr.msra.gmra.mxu2 %v3648_v10  ;;  %1253 = vmatmul.f32.vlgmr.msra.gmra.mxu3 %v3650_v57  ;;  %v1278_v25 = vmul.f32 %v3648_v10, %v3648_v10  ;;  %v1279_v30 = vmul.f32 %v3650_v57, %v3650_v57 }
 0x5cc   :  { %1827 = vmatpush.msk.msra.mxu2 %vm3849_vm6, %v1423_v2  ;;  %1829 = vmatpush.msk.msra.mxu3 %vm3850_vm7, %v1424_v6  ;;  %vm3862_vm6 = vmmov %vm3857_vm1 }
 0x5cd   :  { %vm3863_vm7 = vmmov %vm3857_vm1 }
 0x5d0   :  { %v1132_v17 = vpop.f32.mrf.mxu1  ;;  %v1192_v11 = vpop.f32.mrf.mxu0 }
 0x5d1   :  { %v3654_v23 = vadd.f32 %v1132_v17, %v1110_v36  ;;  %v3656_v29 = vadd.f32 %v1192_v11, %v1110_v36 }
 0x5d3   :  { %1213 = vmatmul.f32.vlgmr.msra.gmra.mxu1 %v3654_v23  ;;  %1273 = vmatmul.f32.vlgmr.msrb.gmra.mxu0 %v3656_v29  ;;  %v1277_v7 = vmul.f32 %v3654_v23, %v3654_v23  ;;  %v1280_v27 = vmul.f32 %v3656_v29, %v3656_v29 }
 0x5d4   :  { %1317 = vmatmul.f32.vlgmr.msrb.gmra.mxu2 %v1278_v25  ;;  %1337 = vmatmul.f32.vlgmr.msrb.gmra.mxu3 %v1279_v30 }
 0x5d5   :  { %1831 = vmatpush.msk.msrb.mxu0 %vm3851_vm11, %v1425_v56  ;;  %1835 = vmatpush.msk.msrb.mxu2 %vm3853_vm9, %v1518_v8  ;;  %vm3864_vm11 = vmmov %vm3857_vm1 }
 0x5d6   :  { %1837 = vmatpush.msk.msrb.mxu3 %vm3854_vm8, %v1519_v62 }
 0x5db   :  { %1297 = vmatmul.f32.vlgmr.msrb.gmra.mxu1 %v1277_v7  ;;  %1357 = vmatmul.f32.vlgmr.msra.gmra.mxu0 %v1280_v27 }
 0x5dc   :  { %1839 = vmatpush.msk.msra.mxu0 %vm3855_vm10, %v1520_v49 }
 0x64e   :  { %v1234_v60 = vpop.f32.mrf.mxu2  ;;  %v1254_v24 = vpop.f32.mrf.mxu3 }
 0x650   :  { %v1214_v51 = vpop.f32.mrf.mxu1  ;;  %v1274_v28 = vpop.f32.mrf.mxu0 }
 0x651   :  { %v1235_v34 = vadd.f32 %v1234_v60, %v1214_v51 }
 0x653   :  { %v1255_v52 = vadd.f32 %v1254_v24, %v1235_v34 }
 0x655   :  { %v1275_v31 = vadd.f32 %v1274_v28, %v1255_v52 }
 0x657   :  { %v1318_v47 = vpop.f32.mrf.mxu2  ;;  %v1338_v37 = vpop.f32.mrf.mxu3 }
 0x658   :  { %v1298_v50 = vpop.f32.mrf.mxu1  ;;  %v1358_v39 = vpop.f32.mrf.mxu0 }
 0x659   :  { %v1319_v1 = vadd.f32 %v1318_v47, %v1298_v50 }
 0x65b   :  { %v1339_v42 = vadd.f32 %v1338_v37, %v1319_v1 }
 0x65d   :  { %v1359_v5 = vadd.f32 %v1358_v39, %v1339_v42 }
 0x65f   :  { %1362 = vrot.lane.b32.xlu2 %v1359_v5, %s2003_s7 }
 0x6b9   :  { %v1363_v48 = vpop.permute.xlu2 %1362 }
 0x6ba   :  { %v1365_v13 = vsel %vm3847_vm4, %v1275_v31, %v1363_v48  ;;  %vm3860_vm4 = vmmov %vm3857_vm1 }
 0x6bb   :  { %1381 = vmatpush.msra.mxu1 %v1365_v13 }
 0x6bc   :  { %1826 = vmatmul.msk.f32.vlgmr.msra.gmra.mxu1 %vm3848_vm5, %v1967_v58  ;;  %vm3861_vm5 = vmmov %vm3857_vm1 }
 0x6bd   :  { %1833 = vmatpush.msk.msrb.mxu1 %vm3852_vm12, %v1426_v38 }
 0x6bf   :  { %1841 = vmatpush.msk.msra.mxu1 %vm3856_vm0, %v1521_v43 }
 0x739   :  { %v1383_v59 = vpop.f32.mrf.mxu1 }
 0x73a   :  { %v1386_v16 = vmul.f32 0.0009765625, %v1383_v59 }
 0x73c   :  { %v1387_v21 = vmul.f32 %v1386_v16, %v1386_v16 }
 0x73e   :  { %1389 = vrot.lane.b32.xlu0 %v1387_v21, %s2003_s7 }
 0x746   :  { %1418 = vperm.xlu0 %1858, %v1196_v45  }
 0x7b0   :  { %v1390_v54 = vpop.permute.xlu0 %1389 }
 0x7b1   :  { %v1392_v40 = vsub.f32 %v1386_v16, %v1390_v54 }
 0x7b3   :  { %v1393_v19 = vmax.f32 %v1392_v40, 0.0 }
 0x7b5   :  { %v1394_v41 = vadd.f32 1e-05, %v1393_v19 }
 0x7b7   :  { %1881 = vrsqrt.f32 %v1394_v41  ;;  %vm1401_vm14 = vweird.f32 %v1394_v41 }
 0x7b8   :  { %v1419_v61 = vpop.permute.xlu0 %1418 }
 0x7bd   :  { %v1882_v53 = vpop.eup %1881 }
 0x7be   :  { %v1396_v55 = vmul.f32 %v1882_v53, %v1394_v41  ;;  %vm1402_vm13 = vweird.f32 %v1882_v53 }
 0x7bf   :  { %vm1403_vm15 = vmor %vm1401_vm14, %vm1402_vm13 }
 0x7c0   :  { %v1397_v32 = vmul.f32 %v1882_v53, %v1396_v55 }
 0x7c2   :  { %v1398_v15 = vmul.f32 0.5, %v1397_v32 }
 0x7c4   :  { %v1399_v26 = vsub.f32 1.5, %v1398_v15 }
 0x7c6   :  { %v1400_v44 = vmul.f32 %v1882_v53, %v1399_v26 }
 0x7c8   :  { %v1404_v0 = vsel %vm1403_vm15, %v1882_v53, %v1400_v44 }
 0x7c9   :  { %v1410_v20 = vmul.f32 %v1408_v63, %v1404_v0 }
 0x7cb   :  { %1412 = vrot.lane.b32.xlu2 %v1410_v20, %s2004_s3 }
 0x825   :  { %v1413_v12 = vpop.permute.xlu2 %1412 }
 0x826   :  { %1828 = vmatmul.msk.f32.vlgmr.msra.gmra.mxu2 %vm3857_vm1, %v1413_v12  ;;  %1830 = vmatmul.msk.f32.vlgmr.msra.gmra.mxu3 %vm3858_vm2, %v1413_v12  ;;  %v1415_v9 = vmul.f32 %v1413_v12, %v1386_v16 }
 0x827   :  { %1832 = vmatmul.msk.f32.vlgmr.msrb.gmra.mxu0 %vm3859_vm3, %v1413_v12  ;;  %1834 = vmatmul.msk.f32.vlgmr.msrb.gmra.mxu1 %vm3860_vm4, %v1413_v12 }
 0x828   :  { %v1421_v14 = vsub.f32 %v1419_v61, %v1415_v9 }
 0x82e   :  { %1836 = vmatmul.msk.f32.vlgmr.msrb.gmra.mxu2 %vm3861_vm5, %v1421_v14  ;;  %1838 = vmatmul.msk.f32.vlgmr.msrb.gmra.mxu3 %vm3862_vm6, %v1421_v14 }
 0x82f   :  { %1840 = vmatmul.msk.f32.vlgmr.msra.gmra.mxu0 %vm3863_vm7, %v1421_v14  ;;  %1842 = vmatmul.msk.f32.vlgmr.msra.gmra.mxu1 %vm3864_vm11, %v1421_v14 }
 0x8a4   :  { %v1494_v4 = vpop.f32.mrf.mxu0  ;;  %v1514_v3 = vpop.f32.mrf.mxu1 }
 0x8a5   :  { %v1615_v36 = vmul.f32 %v1494_v4, %v3650_v57  ;;  %v1616_v18 = vmul.f32 %v1514_v3, %v3656_v29 }
 0x8a9   :  { %v1454_v22 = vpop.f32.mrf.mxu2  ;;  %v1474_v35 = vpop.f32.mrf.mxu3 }
 0x8aa   :  { %v1613_v27 = vmul.f32 %v1454_v22, %v3654_v23  ;;  %v1614_v60 = vmul.f32 %v1474_v35, %v3648_v10 }
 0x8ac   :  { %v1590_v46 = vpop.f32.mrf.mxu0  ;;  %v1610_v17 = vpop.f32.mrf.mxu1 }
 0x8ad   :  { %v3698_v11 = vadd.f32 %v1615_v36, %v1590_v46  ;;  %v3700_v25 = vadd.f32 %v1616_v18, %v1610_v17 }
 0x8af   :  { %v3703_v30 = vmul.f32 0.70710677, %v3698_v11  ;;  %v3706_v7 = vmul.f32 0.70710677, %v3700_v25 }
 0x8b1   :  { %v1639_v57 = vand.u32 2147483647, %v3703_v30  ;;  %v3712_v29 = vand.u32 2147483647, %v3706_v7  ;;  %v1550_v24 = vpop.f32.mrf.mxu2  ;;  %v1570_v51 = vpop.f32.mrf.mxu3 }
 0x8b2   :  { %v3714_v34 = vadd.f32 %v1613_v27, %v1550_v24  ;;  %v3716_v28 = vadd.f32 %v1614_v60, %v1570_v51 }
 0x8b3   :  { %v1643_v52 = vmul.f32 0.3275911, %v1639_v57  ;;  %v1644_v31 = vmul.f32 0.3275911, %v3712_v29  ;;  %v1747_v2 = vsub.f32 0.0, %v1639_v57  ;;  %v1748_v55 = vsub.f32 0.0, %v3712_v29 }
 0x8b4   :  { %v3720_v47 = vmul.f32 0.70710677, %v3714_v34  ;;  %v3723_v23 = vmul.f32 0.70710677, %v3716_v28 }
 0x8b5   :  { %v1647_v10 = vadd.f32 1.0, %v1643_v52  ;;  %v1648_v50 = vadd.f32 1.0, %v1644_v31  ;;  %v1751_v63 = vmul.f32 %v1747_v2, %v1639_v57  ;;  %v1752_v35 = vmul.f32 %v1748_v55, %v3712_v29 }
 0x8b6   :  { %v3726_v1 = vand.u32 2147483647, %v3720_v47  ;;  %v3729_v37 = vand.u32 2147483647, %v3723_v23 }
 0x8b7   :  { %1883 = vrcp.f32 %v1647_v10  ;;  %v1690_v45 = vand.u32 2147483648, %v1647_v10  ;;  %v1688_v38 = vand.u32 2147483647, %v1647_v10  ;;  %v1705_v54 = vand.u32 2147483648, %v1648_v50 }
 0x8b8   :  { %1885 = vrcp.f32 %v1648_v50  ;;  %v1641_v42 = vmul.f32 0.3275911, %v3726_v1  ;;  %v1642_v5 = vmul.f32 0.3275911, %v3729_v37  ;;  %v1703_v19 = vand.u32 2147483647, %v1648_v50 }
 0x8b9   :  { %vm1684_vm14 = vweird.f32 %v1647_v10  ;;  %v1691_v32 = vor.u32 1.1754944e-38, %v1690_v45  ;;  %vm1699_vm9 = vweird.f32 %v1648_v50  ;;  %vm1689_vm8 = vcmp.eq.f32.partialorder %v1688_v38, 8.507059e+37 }
 0x8ba   :  { %v1645_v39 = vadd.f32 1.0, %v1641_v42  ;;  %v3733_v21 = vadd.f32 1.0, %v1642_v5  ;;  %v1706_v0 = vor.u32 1.1754944e-38, %v1705_v54  ;;  %vm1704_vm0 = vcmp.eq.f32.partialorder %v1703_v19, 8.507059e+37 }
 0x8bb   :  { %v1757_v22 = vmul.f32 1.442695, %v1751_v63  ;;  %v1745_v17 = vsub.f32 0.0, %v3726_v1 }
 0x8bc   :  { %1887 = vrcp.f32 %v1645_v39  ;;  %v1658_v12 = vand.u32 2147483647, %v1645_v39  ;;  %v1660_v9 = vand.u32 2147483648, %v1645_v39  ;;  %vm1654_vm2 = vweird.f32 %v1645_v39 }
 0x8bd   :  { %v1884_v48 = vpop.eup %1883  ;;  %1889 = vrcp.f32 %v3733_v21  ;;  %v1673_v52 = vand.u32 2147483647, %v3733_v21  ;;  %v1675_v31 = vand.u32 2147483648, %v3733_v21  ;;  %vm1669_vm6 = vweird.f32 %v3733_v21 }
 0x8be   :  { %v1886_v13 = vpop.eup %1885  ;;  %v1680_v58 = vmul.f32 %v1884_v48, %v1647_v10  ;;  %vm1685_vm12 = vweird.f32 %v1884_v48  ;;  %vm1659_vm4 = vcmp.eq.f32.partialorder %v1658_v12, 8.507059e+37  ;;  %v1661_v60 = vor.u32 1.1754944e-38, %v1660_v9 }
 0x8bf   :  { %v1695_v59 = vmul.f32 %v1886_v13, %v1648_v50  ;;  %vm1700_vm13 = vweird.f32 %v1886_v13  ;;  %vm1686_vm15 = vmor %vm1684_vm14, %vm1685_vm12  ;;  %1891 = vpow2.f32 %v1757_v22  ;;  %v1749_v2 = vmul.f32 %v1745_v17, %v3726_v1 }
 0x8c0   :  { %v1681_v16 = vsub.f32 1.0, %v1680_v58  ;;  %vm1701_vm10 = vmor %vm1699_vm9, %vm1700_vm13  ;;  %vm1674_vm11 = vcmp.eq.f32.partialorder %v1673_v52, 8.507059e+37  ;;  %vm1631_vm12 = vcmp.ge.f32.partialorder %v3703_v30, 0.0  ;;  %vm1632_vm13 = vcmp.ge.f32.partialorder %v3706_v7, 0.0 }
 0x8c1   :  { %v1696_v6 = vsub.f32 1.0, %v1695_v59  ;;  %vm1629_vm14 = vcmp.ge.f32.partialorder %v3720_v47, 0.0 }
 0x8c2   :  { %v1682_v56 = vmul.f32 %v1884_v48, %v1681_v16  ;;  %v1888_v41 = vpop.eup %1887  ;;  %v1676_v16 = vor.u32 1.1754944e-38, %v1675_v31 }
 0x8c3   :  { %v1697_v40 = vmul.f32 %v1886_v13, %v1696_v6  ;;  %v1650_v26 = vmul.f32 %v1888_v41, %v1645_v39  ;;  %v1890_v61 = vpop.eup %1889  ;;  %vm1655_vm1 = vweird.f32 %v1888_v41 }
 0x8c4   :  { %v1683_v53 = vadd.f32 %v1884_v48, %v1682_v56  ;;  %v1665_v36 = vmul.f32 %v1890_v61, %v3733_v21  ;;  %vm1656_vm3 = vmor %vm1654_vm2, %vm1655_vm1  ;;  %vm1670_vm5 = vweird.f32 %v1890_v61 }
 0x8c5   :  { %v1698_v15 = vadd.f32 %v1886_v13, %v1697_v40  ;;  %v1651_v62 = vsub.f32 1.0, %v1650_v26  ;;  %vm1671_vm7 = vmor %vm1669_vm6, %vm1670_vm5  ;;  %v1746_v40 = vsub.f32 0.0, %v3729_v37  ;;  %v1892_v26 = vpop.eup %1891 }
 0x8c6   :  { %v1687_v44 = vsel %vm1686_vm15, %v1884_v48, %v1683_v53  ;;  %v1666_v57 = vsub.f32 1.0, %v1665_v36  ;;  %v1759_v48 = vmul.f32 1.442695, %v1752_v35  ;;  %vm1630_vm15 = vcmp.ge.f32.partialorder %v3723_v23, 0.0 }
 0x8c7   :  { %v3738_v20 = vsel %vm1689_vm8, %v1691_v32, %v1687_v44  ;;  %v1702_v8 = vsel %vm1701_vm10, %v1886_v13, %v1698_v15  ;;  %v1652_v4 = vmul.f32 %v1888_v41, %v1651_v62  ;;  %v1753_v32 = vmul.f32 1.442695, %v1749_v2 }
 0x8c8   :  { %v1711_v49 = vmul.f32 1.0614054, %v3738_v20  ;;  %v1707_v43 = vsel %vm1704_vm0, %v1706_v0, %v1702_v8  ;;  %v1667_v50 = vmul.f32 %v1890_v61, %v1666_v57  ;;  %1893 = vpow2.f32 %v1759_v48 }
 0x8c9   :  { %v1712_v14 = vmul.f32 1.0614054, %v1707_v43  ;;  %v1653_v46 = vadd.f32 %v1888_v41, %v1652_v4  ;;  %v1750_v1 = vmul.f32 %v1746_v40, %v3729_v37  ;;  %1895 = vpow2.f32 %v1753_v32 }
 0x8ca   :  { %v1715_v3 = vadd.f32 -1.4531521, %v1711_v49  ;;  %v1668_v13 = vadd.f32 %v1890_v61, %v1667_v50  ;;  %v1635_v37 = vsel %vm1631_vm12, 1.0, %v2005_v33 }
 0x8cb   :  { %v1716_v18 = vadd.f32 -1.4531521, %v1712_v14  ;;  %v1657_v51 = vsel %vm1656_vm3, %v1888_v41, %v1653_v46 }
 0x8cc   :  { %v1719_v27 = vmul.f32 %v1715_v3, %v3738_v20  ;;  %v1662_v10 = vsel %vm1659_vm4, %v1661_v60, %v1657_v51  ;;  %v1672_v6 = vsel %vm1671_vm7, %v1890_v61, %v1668_v13  ;;  %v1755_v3 = vmul.f32 1.442695, %v1750_v1 }
 0x8cd   :  { %v1720_v24 = vmul.f32 %v1716_v18, %v1707_v43  ;;  %v1709_v39 = vmul.f32 1.0614054, %v1662_v10  ;;  %v1677_v54 = vsel %vm1674_vm11, %v1676_v16, %v1672_v6  ;;  %v1623_v60 = vmul.f32 0.5, %v3698_v11 }
 0x8ce   :  { %v1723_v29 = vadd.f32 1.4214138, %v1719_v27  ;;  %v1710_v41 = vmul.f32 1.0614054, %v1677_v54  ;;  %v1894_v12 = vpop.eup %1893  ;;  %1897 = vpow2.f32 %v1755_v3 }
 0x8cf   :  { %v1724_v42 = vadd.f32 1.4214138, %v1720_v24  ;;  %v1713_v59 = vadd.f32 -1.4531521, %v1709_v39  ;;  %v1896_v27 = vpop.eup %1895  ;;  %v1624_v24 = vmul.f32 0.5, %v3700_v25  ;;  %v1633_v39 = vsel %vm1629_vm14, 1.0, %v2005_v33 }
 0x8d0   :  { %v1727_v5 = vmul.f32 %v1723_v29, %v3738_v20  ;;  %v1714_v15 = vadd.f32 -1.4531521, %v1710_v41  ;;  %v1621_v25 = vmul.f32 0.5, %v3714_v34 }
 0x8d1   :  { %v1728_v58 = vmul.f32 %v1724_v42, %v1707_v43  ;;  %v1717_v38 = vmul.f32 %v1713_v59, %v1662_v10  ;;  %v1634_v59 = vsel %vm1630_vm15, 1.0, %v2005_v33 }
 0x8d2   :  { %v1731_v45 = vadd.f32 -0.28449672, %v1727_v5  ;;  %v1718_v8 = vmul.f32 %v1714_v15, %v1677_v54 }
 0x8d3   :  { %v1732_v56 = vadd.f32 -0.28449672, %v1728_v58  ;;  %v1721_v53 = vadd.f32 1.4214138, %v1717_v38 }
 0x8d4   :  { %v1735_v19 = vmul.f32 %v1731_v45, %v3738_v20  ;;  %v1722_v61 = vadd.f32 1.4214138, %v1718_v8  ;;  %v1898_v5 = vpop.eup %1897  ;;  %v1622_v45 = vmul.f32 0.5, %v3716_v28 }
 0x8d5   :  { %v1736_v21 = vmul.f32 %v1732_v56, %v1707_v43  ;;  %v1725_v63 = vmul.f32 %v1721_v53, %v1662_v10 }
 0x8d6   :  { %v1739_v55 = vadd.f32 0.2548296, %v1735_v19  ;;  %v1726_v35 = vmul.f32 %v1722_v61, %v1677_v54 }
 0x8d7   :  { %v1740_v44 = vadd.f32 0.2548296, %v1736_v21  ;;  %v1729_v49 = vadd.f32 -0.28449672, %v1725_v63 }
 0x8d8   :  { %v1743_v0 = vmul.f32 %v1739_v55, %v3738_v20  ;;  %v1730_v46 = vadd.f32 -0.28449672, %v1726_v35 }
 0x8d9   :  { %v1744_v62 = vmul.f32 %v1740_v44, %v1707_v43  ;;  %v1733_v4 = vmul.f32 %v1729_v49, %v1662_v10  ;;  %v1636_v43 = vsel %vm1632_vm13, 1.0, %v2005_v33 }
 0x8da   :  { %v1763_v9 = vmul.f32 %v1892_v26, %v1743_v0  ;;  %v1734_v57 = vmul.f32 %v1730_v46, %v1677_v54 }
 0x8db   :  { %v1764_v14 = vmul.f32 %v1894_v12, %v1744_v62  ;;  %v1737_v20 = vadd.f32 0.2548296, %v1733_v4 }
 0x8dc   :  { %v1767_v22 = vsub.f32 1.0, %v1763_v9  ;;  %v1738_v29 = vadd.f32 0.2548296, %v1734_v57 }
 0x8dd   :  { %v1768_v36 = vsub.f32 1.0, %v1764_v14  ;;  %v1741_v30 = vmul.f32 %v1737_v20, %v1662_v10 }
 0x8de   :  { %v1771_v18 = vmul.f32 %v1767_v22, %v1635_v37  ;;  %v1742_v10 = vmul.f32 %v1738_v29, %v1677_v54 }
 0x8df   :  { %v1772_v17 = vmul.f32 %v1768_v36, %v1636_v43  ;;  %v1761_v52 = vmul.f32 %v1896_v27, %v1741_v30 }
 0x8e0   :  { %v1775_v7 = vadd.f32 1.0, %v1771_v18  ;;  %v1762_v11 = vmul.f32 %v1898_v5, %v1742_v10 }
 0x8e1   :  { %v1776_v51 = vadd.f32 1.0, %v1772_v17  ;;  %v1765_v42 = vsub.f32 1.0, %v1761_v52 }
 0x8e2   :  { %v1779_v31 = vmul.f32 %v1775_v7, %v1623_v60  ;;  %v1766_v58 = vsub.f32 1.0, %v1762_v11 }
 0x8e3   :  { %v1780_v50 = vmul.f32 %v1776_v51, %v1624_v24  ;;  %v1769_v48 = vmul.f32 %v1765_v42, %v1633_v39 }
 0x8e4   :  { %1783 = vst [vmem:[#allocation2 + $0x10] sm:$0xff] %v1779_v31  ;;  %v1770_v16 = vmul.f32 %v1766_v58, %v1634_v59 }
 0x8e5   :  { %1784 = vst [vmem:[#allocation2 + $0x18] sm:$0xff] %v1780_v50  ;;  %v1773_v13 = vadd.f32 1.0, %v1769_v48 }
 0x8e6   :  { %v1774_v2 = vadd.f32 1.0, %v1770_v16 }
 0x8e7   :  { %v1777_v47 = vmul.f32 %v1773_v13, %v1621_v25 }
 0x8e8   :  { %v1778_v23 = vmul.f32 %v1774_v2, %v1622_v45 }
 0x8e9   :  { %1781 = vst [vmem:[#allocation2] sm:$0xff] %v1777_v47 }
 0x8ea   :  { %1782 = vst [vmem:[#allocation2 + $0x8] sm:$0xff] %v1778_v23 }
 0x8eb   :  { %1795 = dma.vmem_to_hbm [thread:$0]  %s1791_s12, 512, %s1793_s23, [#allocation3]  }
 0x8ec   :  { %1992 = dma.done.wait [#allocation3], 512  }
 0x8ed   :  { %1993 = vsyncadd [#allocation3], 4294966784 }
 0x8ee   :  { %1800 = vsyncpa [#allocation3], 1 }

</bundles_post_ra>
